<compile_context>
chip_gen: v7x
topology: tpu7x:2x2x1
jax: 0.10.0
libtpu: 0.0.40
codegen_flags: <defaults>
</compile_context>

<pallas_src>
import functools
import math

import jax
import jax.numpy as jnp
from jax.experimental import pallas as pl
from jax.experimental.pallas import tpu as pltpu


# --------------------------------------------------------------------------------------
# Hardware / feature probes
# --------------------------------------------------------------------------------------

@functools.lru_cache(maxsize=None)
def _physical_vmem_bytes():
    """Per-core VMEM capacity (generation-aware); conservative fallback = 64 MiB (v7x)."""
    try:
        info = pltpu.get_tpu_info()
        for attr in ("vmem_capacity_bytes", "vmem_bytes", "vmem_size_bytes"):
            cap = getattr(info, attr, None)
            if cap:
                return int(cap)
    except Exception:
        pass
    return 64 << 20


_SINGLE_BUFFER_SUPPORTED = None


def _single_buffer_weights_supported():
    """Probe once whether BlockSpec(pipeline_mode=pl.Buffered(1)) lowers on this install."""
    global _SINGLE_BUFFER_SUPPORTED
    if _SINGLE_BUFFER_SUPPORTED is None:
        try:
            def _copy(x_ref, o_ref):
                o_ref[...] = x_ref[...]
            out = pl.pallas_call(
                _copy,
                out_shape=jax.ShapeDtypeStruct((8, 128), jnp.float32),
                grid=(2,),
                in_specs=[pl.BlockSpec((8, 128), lambda i: (0, 0),
                                       pipeline_mode=pl.Buffered(1))],
                out_specs=pl.BlockSpec((8, 128), lambda i: (0, 0)),
            )(jnp.zeros((8, 128), jnp.float32))
            jax.block_until_ready(out)
            _SINGLE_BUFFER_SUPPORTED = True
        except Exception:
            _SINGLE_BUFFER_SUPPORTED = False
    return _SINGLE_BUFFER_SUPPORTED


# --------------------------------------------------------------------------------------
# VMEM budgeting
# --------------------------------------------------------------------------------------

def _vmem_residency_bytes(bn, L, D, H, weight_buffers):
    bf16, f32 = 2, 4
    weights = 12 * D * D * bf16                              # qkv + out + fc + proj matrices
    smalls = 16 * D * f32                                    # biases + LN gamma/beta
    io = 2 * (2 * bn * L * D * bf16 + bn * L * f32)          # double-buffered x/out blocks + mask
    acts = 14 * bn * L * D * f32                             # x, qkv, q/k/v, ctx, x1, h1, mlp, ...
    scores = 2 * bn * H * L * L * f32                        # s and p
    return weight_buffers * (weights + smalls) + io + acts + scores


def _vmem_limit_bytes(bn, L, D, H, weight_buffers):
    phys = _physical_vmem_bytes()
    need = _vmem_residency_bytes(bn, L, D, H, weight_buffers) + (8 << 20)
    return int(min(max(need, 32 << 20), phys - (4 << 20)))


def _pick_batch_block(N, L, D, H, weight_buffers):
    """Largest batch block that fits VMEM; prefer >=2 (and an even number of) grid steps."""
    budget = _physical_vmem_bytes() - (12 << 20)
    fits = [bn for bn in (8, 4, 2, 1)
            if N % bn == 0 and _vmem_residency_bytes(bn, L, D, H, weight_buffers) <= budget]
    if not fits:
        return 1          # nothing fits comfortably; bn=1 minimizes residency
    for bn in fits:       # even step count splits evenly across v7x's 2 TensorCores
        if N // bn >= 2 and (N // bn) % 2 == 0:
            return bn
    for bn in fits:
        if N // bn >= 2:
            return bn
    return fits[0]


# --------------------------------------------------------------------------------------
# Kernel
# --------------------------------------------------------------------------------------

def _resblock_kernel(x_ref, mask_ref,
                     ln1_g_ref, ln1_b_ref,
                     w_qkv_ref, b_qkv_ref,
                     w_out_ref, b_out_ref,
                     ln2_g_ref, ln2_b_ref,
                     w_fc_ref, b_fc_ref,
                     w_proj_ref, b_proj_ref,
                     o_ref, *, num_heads):
    x = x_ref[...].astype(jnp.float32)                       # (bn, L, D)
    bn, L, D = x.shape
    H = num_heads
    hd = D // H

    # ---- LayerNorm 1 (fp32, matching the fp16-safe LayerNorm subclass) ----
    mu = jnp.mean(x, axis=-1, keepdims=True)
    var = jnp.mean(jnp.square(x - mu), axis=-1, keepdims=True)
    xn = (x - mu) * jax.lax.rsqrt(var + 1e-5) * ln1_g_ref[...] + ln1_b_ref[...]

    # ---- fused QKV projection over all bn*L rows (bf16 in, fp32 accumulate) ----
    xn2d = xn.reshape(bn * L, D).astype(jnp.bfloat16)
    qkv = jnp.dot(xn2d, w_qkv_ref[...], preferred_element_type=jnp.float32)
    qkv = (qkv + b_qkv_ref[...]).reshape(bn, L, 3 * D).astype(jnp.bfloat16)

    # ---- head-major Q/K/V as one (H*bn)-deep batch (row index = h*bn + b) ----
    # Built from static lane slices + leading-axis concatenation: no in-kernel
    # transposes, no per-(batch, head) unrolled matmuls, no masked sub-lane stores.
    q = jnp.concatenate([qkv[:, :, h * hd:(h + 1) * hd] for h in range(H)], axis=0)
    k = jnp.concatenate([qkv[:, :, D + h * hd:D + (h + 1) * hd] for h in range(H)], axis=0)
    v = jnp.concatenate([qkv[:, :, 2 * D + h * hd:2 * D + (h + 1) * hd] for h in range(H)], axis=0)

    # ---- batched scaled-dot-product attention (1/sqrt(hd) pre-folded into Q weights) ----
    s = jnp.einsum('bqd,bkd->bqk', q, k, preferred_element_type=jnp.float32)   # (H*bn, L, L)
    m = mask_ref[...]                                                          # (bn, 1, L)
    s = (s.reshape(H, bn, L, L) + m[None]).reshape(H * bn, L, L)
    s = s - jnp.max(s, axis=-1, keepdims=True)
    p = jnp.exp(s)
    p = p * pl.reciprocal(jnp.sum(p, axis=-1, keepdims=True), approx=True)
    ctx = jnp.einsum('bqk,bkd->bqd', p.astype(jnp.bfloat16), v,
                     preferred_element_type=jnp.float32)                       # (H*bn, L, hd)

    # ---- lane-dense head merge + single full-depth output projection + residual 1 ----
    ctx = ctx.astype(jnp.bfloat16)
    ctx2d = jnp.concatenate([ctx[h * bn:(h + 1) * bn] for h in range(H)],
                            axis=-1).reshape(bn * L, D)
    attn = jnp.dot(ctx2d, w_out_ref[...], preferred_element_type=jnp.float32) + b_out_ref[...]
    x1 = x.reshape(bn * L, D) + attn

    # ---- LayerNorm 2 (fp32) ----
    mu2 = jnp.mean(x1, axis=-1, keepdims=True)
    var2 = jnp.mean(jnp.square(x1 - mu2), axis=-1, keepdims=True)
    xn2 = (x1 - mu2) * jax.lax.rsqrt(var2 + 1e-5) * ln2_g_ref[...] + ln2_b_ref[...]

    # ---- MLP: c_fc -> QuickGELU -> c_proj, residual 2 ----
    # TODO(synk): on VMEM-tight parts (v7x) the 4D hidden could be chunked with an inner
    #             reduction loop instead of materializing the full (bn*L, 4D) h1.
    h1 = jnp.dot(xn2.astype(jnp.bfloat16), w_fc_ref[...],
                 preferred_element_type=jnp.float32) + b_fc_ref[...]
    h1 = h1 * jax.nn.sigmoid(1.702 * h1)
    mlp = jnp.dot(h1.astype(jnp.bfloat16), w_proj_ref[...],
                  preferred_element_type=jnp.float32) + b_proj_ref[...]

    o_ref[...] = (x1 + mlp).reshape(bn, L, D).astype(o_ref.dtype)


# --------------------------------------------------------------------------------------
# pallas_call wrapper (one residual block)
# --------------------------------------------------------------------------------------

def _param_spec(shape, single_buffer):
    nd = len(shape)
    index_map = lambda n, _nd=nd: (0,) * _nd
    if single_buffer:
        # Constant-index weights: keep one VMEM buffer instead of double-buffering.
        return pl.BlockSpec(shape, index_map, pipeline_mode=pl.Buffered(1))
    return pl.BlockSpec(shape, index_map)


def _residual_attention_block(x_nld, mask_add, params, num_heads, bn, single_buffer):
    """One ResidualAttentionBlock.  x_nld: (N, L, D) bf16, mask_add: (N, 1, L) fp32."""
    N, L, D = x_nld.shape
    assert N % bn == 0 and D % num_heads == 0
    weight_buffers = 1 if single_buffer else 2
    kern = functools.partial(_resblock_kernel, num_heads=num_heads)
    in_specs = [
        pl.BlockSpec((bn, L, D), lambda n: (n, 0, 0)),
        pl.BlockSpec((bn, 1, L), lambda n: (n, 0, 0)),
    ] + [_param_spec(p.shape, single_buffer) for p in params]

    flops = int(24 * N * L * D * D + 4 * N * L * L * D)
    transcendentals = int(N * num_heads * L * L + 4 * N * L * D)
    bytes_accessed = int(4 * N * L * D + 24 * D * D + 4 * N * L)

    return pl.pallas_call(
        kern,
        out_shape=jax.ShapeDtypeStruct((N, L, D), jnp.bfloat16),
        grid=(N // bn,),
        in_specs=in_specs,
        out_specs=pl.BlockSpec((bn, L, D), lambda n: (n, 0, 0)),
        compiler_params=pltpu.CompilerParams(
            dimension_semantics=("parallel",),
            vmem_limit_bytes=_vmem_limit_bytes(bn, L, D, num_heads, weight_buffers),
        ),
        cost_estimate=pl.CostEstimate(flops=flops, transcendentals=transcendentals,
                                      bytes_accessed=bytes_accessed),
    )(x_nld, mask_add, *params)


@functools.partial(jax.jit, static_argnums=(3, 4, 5))
def _forward_layers(x, mask_add, params_list, num_heads, bn, single_buffer):
    for params in params_list:
        x = _residual_attention_block(x, mask_add, params, num_heads, bn, single_buffer)
    return x


# --------------------------------------------------------------------------------------
# Module wrapper
# --------------------------------------------------------------------------------------

class PallasCLIPTransformer:
    """JAX/Pallas equivalent of the PyTorch `Transformer` module (inference)."""

    def __init__(self, width: int, layers: int, heads: int, key):
        self.width = width
        self.layers = layers
        self.heads = heads
        self._single_buffer = _single_buffer_weights_supported()
        self.block_params = []
        num_blocks = layers - 1          # matches PyTorch: range(layers - 1)
        D = width
        hd = D // heads
        q_scale = 1.0 / math.sqrt(hd)
        init_scale = 0.02
        for _ in range(num_blocks):
            key, *ks = jax.random.split(key, 9)
            w_in = jax.random.normal(ks[0], (D, 3 * D), jnp.float32) * init_scale
            b_in = jax.random.normal(ks[1], (3 * D,), jnp.float32) * init_scale
            # Fold the 1/sqrt(head_dim) attention scale into the Q columns (free at init).
            w_in = w_in.at[:, :D].multiply(q_scale)
            b_in = b_in.at[:D].multiply(q_scale)
            params = (
                jnp.ones((1, D), jnp.float32),                                    # ln_1.weight
                jnp.zeros((1, D), jnp.float32),                                   # ln_1.bias
                w_in.astype(jnp.bfloat16),                                        # attn.in_proj_weight^T (Q pre-scaled)
                b_in.reshape(1, 3 * D).astype(jnp.float32),                       # attn.in_proj_bias   (Q pre-scaled)
                (jax.random.normal(ks[2], (D, D), jnp.float32) * init_scale
                 ).astype(jnp.bfloat16),                                          # attn.out_proj.weight^T
                jax.random.normal(ks[3], (1, D), jnp.float32) * init_scale,       # attn.out_proj.bias
                jnp.ones((1, D), jnp.float32),                                    # ln_2.weight
                jnp.zeros((1, D), jnp.float32),                                   # ln_2.bias
                (jax.random.normal(ks[4], (D, 4 * D), jnp.float32) * init_scale
                 ).astype(jnp.bfloat16),                                          # mlp.c_fc.weight^T
                jax.random.normal(ks[5], (1, 4 * D), jnp.float32) * init_scale,   # mlp.c_fc.bias
                (jax.random.normal(ks[6], (4 * D, D), jnp.float32) * init_scale
                 ).astype(jnp.bfloat16),                                          # mlp.c_proj.weight^T
                jax.random.normal(ks[7], (1, D), jnp.float32) * init_scale,       # mlp.c_proj.bias
            )
            self.block_params.append(params)

    def __call__(self, x_lnd, x_mask=None):
        # x_lnd is (L, N, D) like PyTorch nn.MultiheadAttention input.
        if not self.block_params:
            return x_lnd
        L, N, D = x_lnd.shape
        orig_dtype = x_lnd.dtype
        Lp = max(8, ((L + 7) // 8) * 8)                       # pad seq to a sublane multiple
        x = jnp.transpose(x_lnd, (1, 0, 2)).astype(jnp.float32)   # (N, L, D)
        if Lp != L:
            x = jnp.pad(x, ((0, 0), (0, Lp - L), (0, 0)))
        # key_padding_mask semantics: True -> key ignored.  Large finite negative keeps
        # fully-masked rows NaN-free (uniform attention over V) unlike PyTorch's NaN.
        if x_mask is None:
            base = jnp.zeros((N, L), jnp.float32)
        else:
            base = jnp.where(x_mask.astype(bool), jnp.float32(-1e9), jnp.float32(0.0))
        if Lp != L:
            base = jnp.pad(base, ((0, 0), (0, Lp - L)), constant_values=-1e9)
        mask_add = base.reshape(N, 1, Lp).astype(jnp.float32)

        weight_buffers = 1 if self._single_buffer else 2
        bn = _pick_batch_block(N, Lp, D, self.heads, weight_buffers)
        # Activations cross layer boundaries in bf16; fp32 math inside the kernel.
        x = _forward_layers(x.astype(jnp.bfloat16), mask_add,
                            tuple(self.block_params), self.heads, bn, self._single_buffer)
        x = x.astype(jnp.float32)
        if Lp != L:
            x = x[:, :L, :]
        return jnp.transpose(x, (1, 0, 2)).astype(orig_dtype)


# --------------------------------------------------------------------------------------
# Pure-JAX reference (same weights; 1/sqrt(hd) already folded into Q weights)
# --------------------------------------------------------------------------------------

def _reference_forward(x_lnd, x_mask, block_params, num_heads):
    x = jnp.transpose(x_lnd, (1, 0, 2)).astype(jnp.float32)          # (N, L, D)
    N, L, D = x.shape
    H = num_heads
    hd = D // H
    if x_mask is None:
        mask_add = jnp.zeros((N, 1, 1, L), jnp.float32)
    else:
        mask_add = jnp.where(x_mask.astype(bool), -1e9, 0.0).astype(jnp.float32).reshape(N, 1, 1, L)
    for (ln1_g, ln1_b, w_qkv, b_qkv, w_out, b_out,
         ln2_g, ln2_b, w_fc, b_fc, w_proj, b_proj) in block_params:
        w_qkv = w_qkv.astype(jnp.float32)
        w_out = w_out.astype(jnp.float32)
        w_fc = w_fc.astype(jnp.float32)
        w_proj = w_proj.astype(jnp.float32)
        mu = x.mean(-1, keepdims=True)
        var = ((x - mu) ** 2).mean(-1, keepdims=True)
        xn = (x - mu) * jax.lax.rsqrt(var + 1e-5) * ln1_g + ln1_b
        qkv = xn @ w_qkv + b_qkv
        q, k, v = qkv[..., :D], qkv[..., D:2 * D], qkv[..., 2 * D:]
        # NOTE: no extra scaling here; 1/sqrt(hd) is folded into the Q weights/bias.
        q = q.reshape(N, L, H, hd).transpose(0, 2, 1, 3)
        k = k.reshape(N, L, H, hd).transpose(0, 2, 1, 3)
        v = v.reshape(N, L, H, hd).transpose(0, 2, 1, 3)
        s = jnp.einsum('nhld,nhmd->nhlm', q, k) + mask_add
        p = jax.nn.softmax(s, axis=-1)
        ctx = jnp.einsum('nhlm,nhmd->nhld', p, v).transpose(0, 2, 1, 3).reshape(N, L, D)
        x = x + ctx @ w_out + b_out
        mu2 = x.mean(-1, keepdims=True)
        var2 = ((x - mu2) ** 2).mean(-1, keepdims=True)
        xn2 = (x - mu2) * jax.lax.rsqrt(var2 + 1e-5) * ln2_g + ln2_b
        h1 = xn2 @ w_fc + b_fc
        h1 = h1 * jax.nn.sigmoid(1.702 * h1)
        x = x + h1 @ w_proj + b_proj
    return jnp.transpose(x, (1, 0, 2))


if __name__ == "__main__":
    key = jax.random.PRNGKey(0)
    k_x, k_p = jax.random.split(key)

    # Small shapes consistent with the module: width=32, heads=4, layers=3 (-> 2 blocks)
    L, N, D = 8, 4, 32
    x = jax.random.normal(k_x, (L, N, D), jnp.float32)

    model = PallasCLIPTransformer(width=D, layers=3, heads=4, key=k_p)

    # unmasked path
    out = jax.block_until_ready(model(x, x_mask=None))
    assert out.shape == (L, N, D), out.shape
    assert bool(jnp.all(jnp.isfinite(out))), "non-finite output (unmasked)"
    ref = _reference_forward(x, None, model.block_params, model.heads)
    err = float(jnp.max(jnp.abs(out - ref)))
    assert err < 5e-2, f"unmasked max abs err {err}"

    # key-padding-mask path (mask out the last key of every batch element)
    x_mask = jnp.zeros((N, L), jnp.bool_).at[:, -1].set(True)
    out_m = jax.block_until_ready(model(x, x_mask=x_mask))
    assert bool(jnp.all(jnp.isfinite(out_m))), "non-finite output (masked)"
    ref_m = _reference_forward(x, x_mask, model.block_params, model.heads)
    err_m = float(jnp.max(jnp.abs(out_m - ref_m)))
    assert err_m < 5e-2, f"masked max abs err {err_m}"

    print("KERNEL_OK")
</pallas_src>

<mosaic_0001>
module attributes {stable_mosaic.version = 11 : i64} {
  func.func @_copy(%arg0: i32, %arg1: memref<8x128xf32, #tpu.memory_space<vmem>>, %arg2: memref<8x128xf32, #tpu.memory_space<vmem>>) attributes {dimension_semantics = [#tpu.dimension_semantics<arbitrary>], iteration_bounds = array<i64: 2>, scalar_prefetch = 0 : i64, scratch_operands = 0 : i64, tpu.core_type = #tpu.core_type<tc>, window_params = [{pipeline_mode = #tpu.pipeline_mode<synchronous>, transform_indices = @transform_0, window_bounds = array<i64: 8, 128>}, {pipeline_mode = #tpu.pipeline_mode<synchronous>, transform_indices = @transform_1, window_bounds = array<i64: 8, 128>}]} {
    %c0 = arith.constant 0 : index
    %c0_0 = arith.constant 0 : index
    %0 = vector.load %arg1[%c0, %c0_0] : memref<8x128xf32, #tpu.memory_space<vmem>>, vector<8x128xf32>
    %c0_1 = arith.constant 0 : index
    %c0_2 = arith.constant 0 : index
    %1 = vector.load %arg2[%c0_1, %c0_2] : memref<8x128xf32, #tpu.memory_space<vmem>>, vector<8x128xf32>
    tpu.vector_store %arg2[%c0_1, %c0_2], %0 {strides = array<i32>} : memref<8x128xf32, #tpu.memory_space<vmem>>, vector<8x128xf32>,
    return
  }
  func.func @transform_0(%arg0: i32) -> (i32, i32) {
    %c0_i32 = arith.constant 0 : i32
    %c0_i32_0 = arith.constant 0 : i32
    %c0_i32_1 = arith.constant 0 : i32
    return %c0_i32, %c0_i32_0 : i32, i32
  }
  func.func @transform_1(%arg0: i32) -> (i32, i32) {
    %c0_i32 = arith.constant 0 : i32
    %c0_i32_0 = arith.constant 0 : i32
    %c0_i32_1 = arith.constant 0 : i32
    return %c0_i32, %c0_i32_0 : i32, i32
  }
}

module attributes {stable_mosaic.version = 11 : i64} {
  func.func @_resblock_kernel(%arg0: i32, %arg1: memref<2x8x32xbf16, #tpu.memory_space<vmem>>, %arg2: memref<2x1x8xf32, #tpu.memory_space<vmem>>, %arg3: memref<1x32xf32, #tpu.memory_space<vmem>>, %arg4: memref<1x32xf32, #tpu.memory_space<vmem>>, %arg5: memref<32x96xbf16, #tpu.memory_space<vmem>>, %arg6: memref<1x96xf32, #tpu.memory_space<vmem>>, %arg7: memref<32x32xbf16, #tpu.memory_space<vmem>>, %arg8: memref<1x32xf32, #tpu.memory_space<vmem>>, %arg9: memref<1x32xf32, #tpu.memory_space<vmem>>, %arg10: memref<1x32xf32, #tpu.memory_space<vmem>>, %arg11: memref<32x128xbf16, #tpu.memory_space<vmem>>, %arg12: memref<1x128xf32, #tpu.memory_space<vmem>>, %arg13: memref<128x32xbf16, #tpu.memory_space<vmem>>, %arg14: memref<1x32xf32, #tpu.memory_space<vmem>>, %arg15: memref<2x8x32xbf16, #tpu.memory_space<vmem>>) attributes {dimension_semantics = [#tpu.dimension_semantics<parallel>], iteration_bounds = array<i64: 2>, scalar_prefetch = 0 : i64, scratch_operands = 0 : i64, tpu.core_type = #tpu.core_type<tc>, window_params = [{transform_indices = @transform_0, window_bounds = array<i64: 2, 8, 32>}, {transform_indices = @transform_1, window_bounds = array<i64: 2, 1, 8>}, {pipeline_mode = #tpu.pipeline_mode<synchronous>, transform_indices = @transform_2, window_bounds = array<i64: 1, 32>}, {pipeline_mode = #tpu.pipeline_mode<synchronous>, transform_indices = @transform_3, window_bounds = array<i64: 1, 32>}, {pipeline_mode = #tpu.pipeline_mode<synchronous>, transform_indices = @transform_4, window_bounds = array<i64: 32, 96>}, {pipeline_mode = #tpu.pipeline_mode<synchronous>, transform_indices = @transform_5, window_bounds = array<i64: 1, 96>}, {pipeline_mode = #tpu.pipeline_mode<synchronous>, transform_indices = @transform_6, window_bounds = array<i64: 32, 32>}, {pipeline_mode = #tpu.pipeline_mode<synchronous>, transform_indices = @transform_7, window_bounds = array<i64: 1, 32>}, {pipeline_mode = #tpu.pipeline_mode<synchronous>, transform_indices = @transform_8, window_bounds = array<i64: 1, 32>}, {pipeline_mode = #tpu.pipeline_mode<synchronous>, transform_indices = @transform_9, window_bounds = array<i64: 1, 32>}, {pipeline_mode = #tpu.pipeline_mode<synchronous>, transform_indices = @transform_10, window_bounds = array<i64: 32, 128>}, {pipeline_mode = #tpu.pipeline_mode<synchronous>, transform_indices = @transform_11, window_bounds = array<i64: 1, 128>}, {pipeline_mode = #tpu.pipeline_mode<synchronous>, transform_indices = @transform_12, window_bounds = array<i64: 128, 32>}, {pipeline_mode = #tpu.pipeline_mode<synchronous>, transform_indices = @transform_13, window_bounds = array<i64: 1, 32>}, {transform_indices = @transform_14, window_bounds = array<i64: 2, 8, 32>}]} {
    %c0 = arith.constant 0 : index
    %c0_0 = arith.constant 0 : index
    %c0_1 = arith.constant 0 : index
    %0 = vector.load %arg1[%c0, %c0_0, %c0_1] : memref<2x8x32xbf16, #tpu.memory_space<vmem>>, vector<2x8x32xbf16>
    %1 = arith.extf %0 : vector<2x8x32xbf16> to vector<2x8x32xf32>
    %cst = arith.constant dense<0.000000e+00> : vector<2x8xf32>
    %2 = vector.multi_reduction <add>, %1, %cst [2] : vector<2x8x32xf32> to vector<2x8xf32>
    %3 = vector.shape_cast %2 : vector<2x8xf32> to vector<2x8x1xf32>
    %cst_2 = arith.constant 3.200000e+01 : f32
    %4 = vector.broadcast %cst_2 : f32 to vector<2x8x1xf32>
    %5 = arith.divf %3, %4 : vector<2x8x1xf32>
    %6 = vector.broadcast %5 : vector<2x8x1xf32> to vector<2x8x32xf32>
    %7 = arith.subf %1, %6 : vector<2x8x32xf32>
    %8 = arith.mulf %7, %7 : vector<2x8x32xf32>
    %cst_3 = arith.constant dense<0.000000e+00> : vector<2x8xf32>
    %9 = vector.multi_reduction <add>, %8, %cst_3 [2] : vector<2x8x32xf32> to vector<2x8xf32>
    %10 = vector.shape_cast %9 : vector<2x8xf32> to vector<2x8x1xf32>
    %cst_4 = arith.constant 3.200000e+01 : f32
    %11 = vector.broadcast %cst_4 : f32 to vector<2x8x1xf32>
    %12 = arith.divf %10, %11 : vector<2x8x1xf32>
    %13 = vector.broadcast %5 : vector<2x8x1xf32> to vector<2x8x32xf32>
    %14 = arith.subf %1, %13 : vector<2x8x32xf32>
    %cst_5 = arith.constant 9.99999974E-6 : f32
    %15 = vector.broadcast %cst_5 : f32 to vector<2x8x1xf32>
    %16 = arith.addf %12, %15 : vector<2x8x1xf32>
    %17 = math.rsqrt %16 : vector<2x8x1xf32>
    %18 = vector.broadcast %17 : vector<2x8x1xf32> to vector<2x8x32xf32>
    %19 = arith.mulf %14, %18 : vector<2x8x32xf32>
    %c0_6 = arith.constant 0 : index
    %c0_7 = arith.constant 0 : index
    %20 = vector.load %arg3[%c0_6, %c0_7] : memref<1x32xf32, #tpu.memory_space<vmem>>, vector<1x32xf32>
    %21 = vector.shape_cast %20 : vector<1x32xf32> to vector<1x1x32xf32>
    %22 = vector.broadcast %21 : vector<1x1x32xf32> to vector<2x8x32xf32>
    %23 = arith.mulf %19, %22 : vector<2x8x32xf32>
    %c0_8 = arith.constant 0 : index
    %c0_9 = arith.constant 0 : index
    %24 = vector.load %arg4[%c0_8, %c0_9] : memref<1x32xf32, #tpu.memory_space<vmem>>, vector<1x32xf32>
    %25 = vector.shape_cast %24 : vector<1x32xf32> to vector<1x1x32xf32>
    %26 = vector.broadcast %25 : vector<1x1x32xf32> to vector<2x8x32xf32>
    %27 = arith.addf %23, %26 : vector<2x8x32xf32>
    %28 = vector.shape_cast %27 : vector<2x8x32xf32> to vector<16x32xf32>
    %29 = arith.truncf %28 : vector<16x32xf32> to vector<16x32xbf16>
    %c0_10 = arith.constant 0 : index
    %c0_11 = arith.constant 0 : index
    %30 = vector.load %arg5[%c0_10, %c0_11] : memref<32x96xbf16, #tpu.memory_space<vmem>>, vector<32x96xbf16>
    %cst_12 = arith.constant dense<0.000000e+00> : vector<16x96xf32>
    %31 = tpu.matmul %29, %30, %cst_12 {dimension_numbers = #tpu.dot_dimension_numbers<[1], [0], [0], [1], [0, 0, 1, 1], [], []>} : vector<16x32xbf16>, vector<32x96xbf16>, vector<16x96xf32> -> vector<16x96xf32>
    %c0_13 = arith.constant 0 : index
    %c0_14 = arith.constant 0 : index
    %32 = vector.load %arg6[%c0_13, %c0_14] : memref<1x96xf32, #tpu.memory_space<vmem>>, vector<1x96xf32>
    %33 = vector.broadcast %32 : vector<1x96xf32> to vector<16x96xf32>
    %34 = arith.addf %31, %33 : vector<16x96xf32>
    %35 = vector.shape_cast %34 : vector<16x96xf32> to vector<2x8x96xf32>
    %36 = arith.truncf %35 : vector<2x8x96xf32> to vector<2x8x96xbf16>
    %37 = vector.extract_strided_slice %36 {offsets = [0, 0, 0], sizes = [2, 8, 8], strides = [1, 1, 1]} : vector<2x8x96xbf16> to vector<2x8x8xbf16>
    %38 = vector.extract_strided_slice %36 {offsets = [0, 0, 8], sizes = [2, 8, 8], strides = [1, 1, 1]} : vector<2x8x96xbf16> to vector<2x8x8xbf16>
    %39 = vector.extract_strided_slice %36 {offsets = [0, 0, 16], sizes = [2, 8, 8], strides = [1, 1, 1]} : vector<2x8x96xbf16> to vector<2x8x8xbf16>
    %40 = vector.extract_strided_slice %36 {offsets = [0, 0, 24], sizes = [2, 8, 8], strides = [1, 1, 1]} : vector<2x8x96xbf16> to vector<2x8x8xbf16>
    %41 = tpu.concatenate %37, %38, %39, %40 in 0 : vector<2x8x8xbf16>, vector<2x8x8xbf16>, vector<2x8x8xbf16>, vector<2x8x8xbf16> -> vector<8x8x8xbf16>
    %42 = vector.extract_strided_slice %36 {offsets = [0, 0, 32], sizes = [2, 8, 8], strides = [1, 1, 1]} : vector<2x8x96xbf16> to vector<2x8x8xbf16>
    %43 = vector.extract_strided_slice %36 {offsets = [0, 0, 40], sizes = [2, 8, 8], strides = [1, 1, 1]} : vector<2x8x96xbf16> to vector<2x8x8xbf16>
    %44 = vector.extract_strided_slice %36 {offsets = [0, 0, 48], sizes = [2, 8, 8], strides = [1, 1, 1]} : vector<2x8x96xbf16> to vector<2x8x8xbf16>
    %45 = vector.extract_strided_slice %36 {offsets = [0, 0, 56], sizes = [2, 8, 8], strides = [1, 1, 1]} : vector<2x8x96xbf16> to vector<2x8x8xbf16>
    %46 = tpu.concatenate %42, %43, %44, %45 in 0 : vector<2x8x8xbf16>, vector<2x8x8xbf16>, vector<2x8x8xbf16>, vector<2x8x8xbf16> -> vector<8x8x8xbf16>
    %47 = vector.extract_strided_slice %36 {offsets = [0, 0, 64], sizes = [2, 8, 8], strides = [1, 1, 1]} : vector<2x8x96xbf16> to vector<2x8x8xbf16>
    %48 = vector.extract_strided_slice %36 {offsets = [0, 0, 72], sizes = [2, 8, 8], strides = [1, 1, 1]} : vector<2x8x96xbf16> to vector<2x8x8xbf16>
    %49 = vector.extract_strided_slice %36 {offsets = [0, 0, 80], sizes = [2, 8, 8], strides = [1, 1, 1]} : vector<2x8x96xbf16> to vector<2x8x8xbf16>
    %50 = vector.extract_strided_slice %36 {offsets = [0, 0, 88], sizes = [2, 8, 8], strides = [1, 1, 1]} : vector<2x8x96xbf16> to vector<2x8x8xbf16>
    %51 = tpu.concatenate %47, %48, %49, %50 in 0 : vector<2x8x8xbf16>, vector<2x8x8xbf16>, vector<2x8x8xbf16>, vector<2x8x8xbf16> -> vector<8x8x8xbf16>
    "tpu.trace_start"() <{level = 10 : i32, message = "bqd,bkd->bqk"}> : () -> ()
    %cst_15 = arith.constant dense<0.000000e+00> : vector<8x8x8xf32>
    %52 = tpu.matmul %41, %46, %cst_15 {dimension_numbers = #tpu.dot_dimension_numbers<[2], [2], [1], [1], [0, 0, 0, 1, 1, 1], [0], [0]>} : vector<8x8x8xbf16>, vector<8x8x8xbf16>, vector<8x8x8xf32> -> vector<8x8x8xf32>
    "tpu.trace_stop"() : () -> ()
    %c0_16 = arith.constant 0 : index
    %c0_17 = arith.constant 0 : index
    %c0_18 = arith.constant 0 : index
    %53 = vector.load %arg2[%c0_16, %c0_17, %c0_18] : memref<2x1x8xf32, #tpu.memory_space<vmem>>, vector<2x1x8xf32>
    %54 = vector.shape_cast %52 : vector<8x8x8xf32> to vector<4x2x8x8xf32>
    %55 = vector.shape_cast %53 : vector<2x1x8xf32> to vector<1x2x1x8xf32>
    %56 = vector.broadcast %55 : vector<1x2x1x8xf32> to vector<4x2x8x8xf32>
    %57 = arith.addf %54, %56 : vector<4x2x8x8xf32>
    %58 = vector.shape_cast %57 : vector<4x2x8x8xf32> to vector<8x8x8xf32>
    %cst_19 = arith.constant dense<0xFF800000> : vector<8x8xf32>
    %59 = vector.multi_reduction <maximumf>, %58, %cst_19 [2] : vector<8x8x8xf32> to vector<8x8xf32>
    %60 = vector.shape_cast %59 : vector<8x8xf32> to vector<8x8x1xf32>
    %61 = vector.broadcast %60 : vector<8x8x1xf32> to vector<8x8x8xf32>
    %62 = arith.subf %58, %61 : vector<8x8x8xf32>
    %63 = math.exp %62 : vector<8x8x8xf32>
    %cst_20 = arith.constant dense<0.000000e+00> : vector<8x8xf32>
    %64 = vector.multi_reduction <add>, %63, %cst_20 [2] : vector<8x8x8xf32> to vector<8x8xf32>
    %65 = vector.shape_cast %64 : vector<8x8xf32> to vector<8x8x1xf32>
    %66 = tpu.reciprocal %65 {approx = true} : vector<8x8x1xf32> -> vector<8x8x1xf32>
    %67 = vector.broadcast %66 : vector<8x8x1xf32> to vector<8x8x8xf32>
    %68 = arith.mulf %63, %67 : vector<8x8x8xf32>
    %69 = arith.truncf %68 : vector<8x8x8xf32> to vector<8x8x8xbf16>
    "tpu.trace_start"() <{level = 10 : i32, message = "bqk,bkd->bqd"}> : () -> ()
    %cst_21 = arith.constant dense<0.000000e+00> : vector<8x8x8xf32>
    %70 = tpu.matmul %69, %51, %cst_21 {dimension_numbers = #tpu.dot_dimension_numbers<[2], [1], [1], [2], [0, 0, 0, 1, 1, 2], [0], [0]>} : vector<8x8x8xbf16>, vector<8x8x8xbf16>, vector<8x8x8xf32> -> vector<8x8x8xf32>
    "tpu.trace_stop"() : () -> ()
    %71 = arith.truncf %70 : vector<8x8x8xf32> to vector<8x8x8xbf16>
    %72 = vector.extract_strided_slice %71 {offsets = [0, 0, 0], sizes = [2, 8, 8], strides = [1, 1, 1]} : vector<8x8x8xbf16> to vector<2x8x8xbf16>
    %73 = vector.extract_strided_slice %71 {offsets = [2, 0, 0], sizes = [2, 8, 8], strides = [1, 1, 1]} : vector<8x8x8xbf16> to vector<2x8x8xbf16>
    %74 = vector.extract_strided_slice %71 {offsets = [4, 0, 0], sizes = [2, 8, 8], strides = [1, 1, 1]} : vector<8x8x8xbf16> to vector<2x8x8xbf16>
    %75 = vector.extract_strided_slice %71 {offsets = [6, 0, 0], sizes = [2, 8, 8], strides = [1, 1, 1]} : vector<8x8x8xbf16> to vector<2x8x8xbf16>
    %76 = tpu.concatenate %72, %73, %74, %75 in 2 : vector<2x8x8xbf16>, vector<2x8x8xbf16>, vector<2x8x8xbf16>, vector<2x8x8xbf16> -> vector<2x8x32xbf16>
    %77 = vector.shape_cast %76 : vector<2x8x32xbf16> to vector<16x32xbf16>
    %c0_22 = arith.constant 0 : index
    %c0_23 = arith.constant 0 : index
    %78 = vector.load %arg7[%c0_22, %c0_23] : memref<32x32xbf16, #tpu.memory_space<vmem>>, vector<32x32xbf16>
    %cst_24 = arith.constant dense<0.000000e+00> : vector<16x32xf32>
    %79 = tpu.matmul %77, %78, %cst_24 {dimension_numbers = #tpu.dot_dimension_numbers<[1], [0], [0], [1], [0, 0, 1, 1], [], []>} : vector<16x32xbf16>, vector<32x32xbf16>, vector<16x32xf32> -> vector<16x32xf32>
    %c0_25 = arith.constant 0 : index
    %c0_26 = arith.constant 0 : index
    %80 = vector.load %arg8[%c0_25, %c0_26] : memref<1x32xf32, #tpu.memory_space<vmem>>, vector<1x32xf32>
    %81 = vector.broadcast %80 : vector<1x32xf32> to vector<16x32xf32>
    %82 = arith.addf %79, %81 : vector<16x32xf32>
    %83 = vector.shape_cast %1 : vector<2x8x32xf32> to vector<16x32xf32>
    %84 = arith.addf %83, %82 : vector<16x32xf32>
    %cst_27 = arith.constant dense<0.000000e+00> : vector<16xf32>
    %85 = vector.multi_reduction <add>, %84, %cst_27 [1] : vector<16x32xf32> to vector<16xf32>
    %86 = vector.shape_cast %85 : vector<16xf32> to vector<16x1xf32>
    %cst_28 = arith.constant 3.200000e+01 : f32
    %87 = vector.broadcast %cst_28 : f32 to vector<16x1xf32>
    %88 = arith.divf %86, %87 : vector<16x1xf32>
    %89 = vector.broadcast %88 : vector<16x1xf32> to vector<16x32xf32>
    %90 = arith.subf %84, %89 : vector<16x32xf32>
    %91 = arith.mulf %90, %90 : vector<16x32xf32>
    %cst_29 = arith.constant dense<0.000000e+00> : vector<16xf32>
    %92 = vector.multi_reduction <add>, %91, %cst_29 [1] : vector<16x32xf32> to vector<16xf32>
    %93 = vector.shape_cast %92 : vector<16xf32> to vector<16x1xf32>
    %cst_30 = arith.constant 3.200000e+01 : f32
    %94 = vector.broadcast %cst_30 : f32 to vector<16x1xf32>
    %95 = arith.divf %93, %94 : vector<16x1xf32>
    %96 = vector.broadcast %88 : vector<16x1xf32> to vector<16x32xf32>
    %97 = arith.subf %84, %96 : vector<16x32xf32>
    %cst_31 = arith.constant 9.99999974E-6 : f32
    %98 = vector.broadcast %cst_31 : f32 to vector<16x1xf32>
    %99 = arith.addf %95, %98 : vector<16x1xf32>
    %100 = math.rsqrt %99 : vector<16x1xf32>
    %101 = vector.broadcast %100 : vector<16x1xf32> to vector<16x32xf32>
    %102 = arith.mulf %97, %101 : vector<16x32xf32>
    %c0_32 = arith.constant 0 : index
    %c0_33 = arith.constant 0 : index
    %103 = vector.load %arg9[%c0_32, %c0_33] : memref<1x32xf32, #tpu.memory_space<vmem>>, vector<1x32xf32>
    %104 = vector.broadcast %103 : vector<1x32xf32> to vector<16x32xf32>
    %105 = arith.mulf %102, %104 : vector<16x32xf32>
    %c0_34 = arith.constant 0 : index
    %c0_35 = arith.constant 0 : index
    %106 = vector.load %arg10[%c0_34, %c0_35] : memref<1x32xf32, #tpu.memory_space<vmem>>, vector<1x32xf32>
    %107 = vector.broadcast %106 : vector<1x32xf32> to vector<16x32xf32>
    %108 = arith.addf %105, %107 : vector<16x32xf32>
    %109 = arith.truncf %108 : vector<16x32xf32> to vector<16x32xbf16>
    %c0_36 = arith.constant 0 : index
    %c0_37 = arith.constant 0 : index
    %110 = vector.load %arg11[%c0_36, %c0_37] : memref<32x128xbf16, #tpu.memory_space<vmem>>, vector<32x128xbf16>
    %cst_38 = arith.constant dense<0.000000e+00> : vector<16x128xf32>
    %111 = tpu.matmul %109, %110, %cst_38 {dimension_numbers = #tpu.dot_dimension_numbers<[1], [0], [0], [1], [0, 0, 1, 1], [], []>} : vector<16x32xbf16>, vector<32x128xbf16>, vector<16x128xf32> -> vector<16x128xf32>
    %c0_39 = arith.constant 0 : index
    %c0_40 = arith.constant 0 : index
    %112 = vector.load %arg12[%c0_39, %c0_40] : memref<1x128xf32, #tpu.memory_space<vmem>>, vector<1x128xf32>
    %113 = vector.broadcast %112 : vector<1x128xf32> to vector<16x128xf32>
    %114 = arith.addf %111, %113 : vector<16x128xf32>
    %cst_41 = arith.constant 1.702000e+00 : f32
    %115 = vector.broadcast %cst_41 : f32 to vector<16x128xf32>
    %116 = arith.mulf %115, %114 : vector<16x128xf32>
    %117 = arith.negf %116 : vector<16x128xf32>
    %118 = math.exp %117 : vector<16x128xf32>
    %cst_42 = arith.constant 1.000000e+00 : f32
    %119 = vector.broadcast %cst_42 : f32 to vector<16x128xf32>
    %120 = arith.addf %119, %118 : vector<16x128xf32>
    %121 = arith.divf %119, %120 : vector<16x128xf32>
    %122 = arith.mulf %114, %121 : vector<16x128xf32>
    %123 = arith.truncf %122 : vector<16x128xf32> to vector<16x128xbf16>
    %c0_43 = arith.constant 0 : index
    %c0_44 = arith.constant 0 : index
    %124 = vector.load %arg13[%c0_43, %c0_44] : memref<128x32xbf16, #tpu.memory_space<vmem>>, vector<128x32xbf16>
    %cst_45 = arith.constant dense<0.000000e+00> : vector<16x32xf32>
    %125 = tpu.matmul %123, %124, %cst_45 {dimension_numbers = #tpu.dot_dimension_numbers<[1], [0], [0], [1], [0, 0, 1, 1], [], []>} : vector<16x128xbf16>, vector<128x32xbf16>, vector<16x32xf32> -> vector<16x32xf32>
    %c0_46 = arith.constant 0 : index
    %c0_47 = arith.constant 0 : index
    %126 = vector.load %arg14[%c0_46, %c0_47] : memref<1x32xf32, #tpu.memory_space<vmem>>, vector<1x32xf32>
    %127 = vector.broadcast %126 : vector<1x32xf32> to vector<16x32xf32>
    %128 = arith.addf %125, %127 : vector<16x32xf32>
    %129 = arith.addf %84, %128 : vector<16x32xf32>
    %130 = vector.shape_cast %129 : vector<16x32xf32> to vector<2x8x32xf32>
    %131 = arith.truncf %130 : vector<2x8x32xf32> to vector<2x8x32xbf16>
    %c0_48 = arith.constant 0 : index
    %c0_49 = arith.constant 0 : index
    %c0_50 = arith.constant 0 : index
    %132 = vector.load %arg15[%c0_48, %c0_49, %c0_50] : memref<2x8x32xbf16, #tpu.memory_space<vmem>>, vector<2x8x32xbf16>
    tpu.vector_store %arg15[%c0_48, %c0_49, %c0_50], %131 {strides = array<i32>} : memref<2x8x32xbf16, #tpu.memory_space<vmem>>, vector<2x8x32xbf16>,
    return
  }
  func.func @transform_0(%arg0: i32) -> (i32, i32, i32) {
    %c0_i32 = arith.constant 0 : i32
    %c0_i32_0 = arith.constant 0 : i32
    %c0_i32_1 = arith.constant 0 : i32
    return %arg0, %c0_i32, %c0_i32_0 : i32, i32, i32
  }
  func.func @transform_1(%arg0: i32) -> (i32, i32, i32) {
    %c0_i32 = arith.constant 0 : i32
    %c0_i32_0 = arith.constant 0 : i32
    %c0_i32_1 = arith.constant 0 : i32
    return %arg0, %c0_i32, %c0_i32_0 : i32, i32, i32
  }
  func.func @transform_2(%arg0: i32) -> (i32, i32) {
    %c0_i32 = arith.constant 0 : i32
    %c0_i32_0 = arith.constant 0 : i32
    %c0_i32_1 = arith.constant 0 : i32
    return %c0_i32, %c0_i32_0 : i32, i32
  }
  func.func @transform_3(%arg0: i32) -> (i32, i32) {
    %c0_i32 = arith.constant 0 : i32
    %c0_i32_0 = arith.constant 0 : i32
    %c0_i32_1 = arith.constant 0 : i32
    return %c0_i32, %c0_i32_0 : i32, i32
  }
  func.func @transform_4(%arg0: i32) -> (i32, i32) {
    %c0_i32 = arith.constant 0 : i32
    %c0_i32_0 = arith.constant 0 : i32
    %c0_i32_1 = arith.constant 0 : i32
    return %c0_i32, %c0_i32_0 : i32, i32
  }
  func.func @transform_5(%arg0: i32) -> (i32, i32) {
    %c0_i32 = arith.constant 0 : i32
    %c0_i32_0 = arith.constant 0 : i32
    %c0_i32_1 = arith.constant 0 : i32
    return %c0_i32, %c0_i32_0 : i32, i32
  }
  func.func @transform_6(%arg0: i32) -> (i32, i32) {
    %c0_i32 = arith.constant 0 : i32
    %c0_i32_0 = arith.constant 0 : i32
    %c0_i32_1 = arith.constant 0 : i32
    return %c0_i32, %c0_i32_0 : i32, i32
  }
  func.func @transform_7(%arg0: i32) -> (i32, i32) {
    %c0_i32 = arith.constant 0 : i32
    %c0_i32_0 = arith.constant 0 : i32
    %c0_i32_1 = arith.constant 0 : i32
    return %c0_i32, %c0_i32_0 : i32, i32
  }
  func.func @transform_8(%arg0: i32) -> (i32, i32) {
    %c0_i32 = arith.constant 0 : i32
    %c0_i32_0 = arith.constant 0 : i32
    %c0_i32_1 = arith.constant 0 : i32
    return %c0_i32, %c0_i32_0 : i32, i32
  }
  func.func @transform_9(%arg0: i32) -> (i32, i32) {
    %c0_i32 = arith.constant 0 : i32
    %c0_i32_0 = arith.constant 0 : i32
    %c0_i32_1 = arith.constant 0 : i32
    return %c0_i32, %c0_i32_0 : i32, i32
  }
  func.func @transform_10(%arg0: i32) -> (i32, i32) {
    %c0_i32 = arith.constant 0 : i32
    %c0_i32_0 = arith.constant 0 : i32
    %c0_i32_1 = arith.constant 0 : i32
    return %c0_i32, %c0_i32_0 : i32, i32
  }
  func.func @transform_11(%arg0: i32) -> (i32, i32) {
    %c0_i32 = arith.constant 0 : i32
    %c0_i32_0 = arith.constant 0 : i32
    %c0_i32_1 = arith.constant 0 : i32
    return %c0_i32, %c0_i32_0 : i32, i32
  }
  func.func @transform_12(%arg0: i32) -> (i32, i32) {
    %c0_i32 = arith.constant 0 : i32
    %c0_i32_0 = arith.constant 0 : i32
    %c0_i32_1 = arith.constant 0 : i32
    return %c0_i32, %c0_i32_0 : i32, i32
  }
  func.func @transform_13(%arg0: i32) -> (i32, i32) {
    %c0_i32 = arith.constant 0 : i32
    %c0_i32_0 = arith.constant 0 : i32
    %c0_i32_1 = arith.constant 0 : i32
    return %c0_i32, %c0_i32_0 : i32, i32
  }
  func.func @transform_14(%arg0: i32) -> (i32, i32, i32) {
    %c0_i32 = arith.constant 0 : i32
    %c0_i32_0 = arith.constant 0 : i32
    %c0_i32_1 = arith.constant 0 : i32
    return %arg0, %c0_i32, %c0_i32_0 : i32, i32, i32
  }
}

module attributes {stable_mosaic.version = 11 : i64} {
  func.func @_resblock_kernel(%arg0: i32, %arg1: memref<2x8x32xbf16, #tpu.memory_space<vmem>>, %arg2: memref<2x1x8xf32, #tpu.memory_space<vmem>>, %arg3: memref<1x32xf32, #tpu.memory_space<vmem>>, %arg4: memref<1x32xf32, #tpu.memory_space<vmem>>, %arg5: memref<32x96xbf16, #tpu.memory_space<vmem>>, %arg6: memref<1x96xf32, #tpu.memory_space<vmem>>, %arg7: memref<32x32xbf16, #tpu.memory_space<vmem>>, %arg8: memref<1x32xf32, #tpu.memory_space<vmem>>, %arg9: memref<1x32xf32, #tpu.memory_space<vmem>>, %arg10: memref<1x32xf32, #tpu.memory_space<vmem>>, %arg11: memref<32x128xbf16, #tpu.memory_space<vmem>>, %arg12: memref<1x128xf32, #tpu.memory_space<vmem>>, %arg13: memref<128x32xbf16, #tpu.memory_space<vmem>>, %arg14: memref<1x32xf32, #tpu.memory_space<vmem>>, %arg15: memref<2x8x32xbf16, #tpu.memory_space<vmem>>) attributes {dimension_semantics = [#tpu.dimension_semantics<parallel>], iteration_bounds = array<i64: 2>, scalar_prefetch = 0 : i64, scratch_operands = 0 : i64, tpu.core_type = #tpu.core_type<tc>, window_params = [{transform_indices = @transform_0, window_bounds = array<i64: 2, 8, 32>}, {transform_indices = @transform_1, window_bounds = array<i64: 2, 1, 8>}, {pipeline_mode = #tpu.pipeline_mode<synchronous>, transform_indices = @transform_2, window_bounds = array<i64: 1, 32>}, {pipeline_mode = #tpu.pipeline_mode<synchronous>, transform_indices = @transform_3, window_bounds = array<i64: 1, 32>}, {pipeline_mode = #tpu.pipeline_mode<synchronous>, transform_indices = @transform_4, window_bounds = array<i64: 32, 96>}, {pipeline_mode = #tpu.pipeline_mode<synchronous>, transform_indices = @transform_5, window_bounds = array<i64: 1, 96>}, {pipeline_mode = #tpu.pipeline_mode<synchronous>, transform_indices = @transform_6, window_bounds = array<i64: 32, 32>}, {pipeline_mode = #tpu.pipeline_mode<synchronous>, transform_indices = @transform_7, window_bounds = array<i64: 1, 32>}, {pipeline_mode = #tpu.pipeline_mode<synchronous>, transform_indices = @transform_8, window_bounds = array<i64: 1, 32>}, {pipeline_mode = #tpu.pipeline_mode<synchronous>, transform_indices = @transform_9, window_bounds = array<i64: 1, 32>}, {pipeline_mode = #tpu.pipeline_mode<synchronous>, transform_indices = @transform_10, window_bounds = array<i64: 32, 128>}, {pipeline_mode = #tpu.pipeline_mode<synchronous>, transform_indices = @transform_11, window_bounds = array<i64: 1, 128>}, {pipeline_mode = #tpu.pipeline_mode<synchronous>, transform_indices = @transform_12, window_bounds = array<i64: 128, 32>}, {pipeline_mode = #tpu.pipeline_mode<synchronous>, transform_indices = @transform_13, window_bounds = array<i64: 1, 32>}, {transform_indices = @transform_14, window_bounds = array<i64: 2, 8, 32>}]} {
    %c0 = arith.constant 0 : index
    %c0_0 = arith.constant 0 : index
    %c0_1 = arith.constant 0 : index
    %0 = vector.load %arg1[%c0, %c0_0, %c0_1] : memref<2x8x32xbf16, #tpu.memory_space<vmem>>, vector<2x8x32xbf16>
    %1 = arith.extf %0 : vector<2x8x32xbf16> to vector<2x8x32xf32>
    %cst = arith.constant dense<0.000000e+00> : vector<2x8xf32>
    %2 = vector.multi_reduction <add>, %1, %cst [2] : vector<2x8x32xf32> to vector<2x8xf32>
    %3 = vector.shape_cast %2 : vector<2x8xf32> to vector<2x8x1xf32>
    %cst_2 = arith.constant 3.200000e+01 : f32
    %4 = vector.broadcast %cst_2 : f32 to vector<2x8x1xf32>
    %5 = arith.divf %3, %4 : vector<2x8x1xf32>
    %6 = vector.broadcast %5 : vector<2x8x1xf32> to vector<2x8x32xf32>
    %7 = arith.subf %1, %6 : vector<2x8x32xf32>
    %8 = arith.mulf %7, %7 : vector<2x8x32xf32>
    %cst_3 = arith.constant dense<0.000000e+00> : vector<2x8xf32>
    %9 = vector.multi_reduction <add>, %8, %cst_3 [2] : vector<2x8x32xf32> to vector<2x8xf32>
    %10 = vector.shape_cast %9 : vector<2x8xf32> to vector<2x8x1xf32>
    %cst_4 = arith.constant 3.200000e+01 : f32
    %11 = vector.broadcast %cst_4 : f32 to vector<2x8x1xf32>
    %12 = arith.divf %10, %11 : vector<2x8x1xf32>
    %13 = vector.broadcast %5 : vector<2x8x1xf32> to vector<2x8x32xf32>
    %14 = arith.subf %1, %13 : vector<2x8x32xf32>
    %cst_5 = arith.constant 9.99999974E-6 : f32
    %15 = vector.broadcast %cst_5 : f32 to vector<2x8x1xf32>
    %16 = arith.addf %12, %15 : vector<2x8x1xf32>
    %17 = math.rsqrt %16 : vector<2x8x1xf32>
    %18 = vector.broadcast %17 : vector<2x8x1xf32> to vector<2x8x32xf32>
    %19 = arith.mulf %14, %18 : vector<2x8x32xf32>
    %c0_6 = arith.constant 0 : index
    %c0_7 = arith.constant 0 : index
    %20 = vector.load %arg3[%c0_6, %c0_7] : memref<1x32xf32, #tpu.memory_space<vmem>>, vector<1x32xf32>
    %21 = vector.shape_cast %20 : vector<1x32xf32> to vector<1x1x32xf32>
    %22 = vector.broadcast %21 : vector<1x1x32xf32> to vector<2x8x32xf32>
    %23 = arith.mulf %19, %22 : vector<2x8x32xf32>
    %c0_8 = arith.constant 0 : index
    %c0_9 = arith.constant 0 : index
    %24 = vector.load %arg4[%c0_8, %c0_9] : memref<1x32xf32, #tpu.memory_space<vmem>>, vector<1x32xf32>
    %25 = vector.shape_cast %24 : vector<1x32xf32> to vector<1x1x32xf32>
    %26 = vector.broadcast %25 : vector<1x1x32xf32> to vector<2x8x32xf32>
    %27 = arith.addf %23, %26 : vector<2x8x32xf32>
    %28 = vector.shape_cast %27 : vector<2x8x32xf32> to vector<16x32xf32>
    %29 = arith.truncf %28 : vector<16x32xf32> to vector<16x32xbf16>
    %c0_10 = arith.constant 0 : index
    %c0_11 = arith.constant 0 : index
    %30 = vector.load %arg5[%c0_10, %c0_11] : memref<32x96xbf16, #tpu.memory_space<vmem>>, vector<32x96xbf16>
    %cst_12 = arith.constant dense<0.000000e+00> : vector<16x96xf32>
    %31 = tpu.matmul %29, %30, %cst_12 {dimension_numbers = #tpu.dot_dimension_numbers<[1], [0], [0], [1], [0, 0, 1, 1], [], []>} : vector<16x32xbf16>, vector<32x96xbf16>, vector<16x96xf32> -> vector<16x96xf32>
    %c0_13 = arith.constant 0 : index
    %c0_14 = arith.constant 0 : index
    %32 = vector.load %arg6[%c0_13, %c0_14] : memref<1x96xf32, #tpu.memory_space<vmem>>, vector<1x96xf32>
    %33 = vector.broadcast %32 : vector<1x96xf32> to vector<16x96xf32>
    %34 = arith.addf %31, %33 : vector<16x96xf32>
    %35 = vector.shape_cast %34 : vector<16x96xf32> to vector<2x8x96xf32>
    %36 = arith.truncf %35 : vector<2x8x96xf32> to vector<2x8x96xbf16>
    %37 = vector.extract_strided_slice %36 {offsets = [0, 0, 0], sizes = [2, 8, 8], strides = [1, 1, 1]} : vector<2x8x96xbf16> to vector<2x8x8xbf16>
    %38 = vector.extract_strided_slice %36 {offsets = [0, 0, 8], sizes = [2, 8, 8], strides = [1, 1, 1]} : vector<2x8x96xbf16> to vector<2x8x8xbf16>
    %39 = vector.extract_strided_slice %36 {offsets = [0, 0, 16], sizes = [2, 8, 8], strides = [1, 1, 1]} : vector<2x8x96xbf16> to vector<2x8x8xbf16>
    %40 = vector.extract_strided_slice %36 {offsets = [0, 0, 24], sizes = [2, 8, 8], strides = [1, 1, 1]} : vector<2x8x96xbf16> to vector<2x8x8xbf16>
    %41 = tpu.concatenate %37, %38, %39, %40 in 0 : vector<2x8x8xbf16>, vector<2x8x8xbf16>, vector<2x8x8xbf16>, vector<2x8x8xbf16> -> vector<8x8x8xbf16>
    %42 = vector.extract_strided_slice %36 {offsets = [0, 0, 32], sizes = [2, 8, 8], strides = [1, 1, 1]} : vector<2x8x96xbf16> to vector<2x8x8xbf16>
    %43 = vector.extract_strided_slice %36 {offsets = [0, 0, 40], sizes = [2, 8, 8], strides = [1, 1, 1]} : vector<2x8x96xbf16> to vector<2x8x8xbf16>
    %44 = vector.extract_strided_slice %36 {offsets = [0, 0, 48], sizes = [2, 8, 8], strides = [1, 1, 1]} : vector<2x8x96xbf16> to vector<2x8x8xbf16>
    %45 = vector.extract_strided_slice %36 {offsets = [0, 0, 56], sizes = [2, 8, 8], strides = [1, 1, 1]} : vector<2x8x96xbf16> to vector<2x8x8xbf16>
    %46 = tpu.concatenate %42, %43, %44, %45 in 0 : vector<2x8x8xbf16>, vector<2x8x8xbf16>, vector<2x8x8xbf16>, vector<2x8x8xbf16> -> vector<8x8x8xbf16>
    %47 = vector.extract_strided_slice %36 {offsets = [0, 0, 64], sizes = [2, 8, 8], strides = [1, 1, 1]} : vector<2x8x96xbf16> to vector<2x8x8xbf16>
    %48 = vector.extract_strided_slice %36 {offsets = [0, 0, 72], sizes = [2, 8, 8], strides = [1, 1, 1]} : vector<2x8x96xbf16> to vector<2x8x8xbf16>
    %49 = vector.extract_strided_slice %36 {offsets = [0, 0, 80], sizes = [2, 8, 8], strides = [1, 1, 1]} : vector<2x8x96xbf16> to vector<2x8x8xbf16>
    %50 = vector.extract_strided_slice %36 {offsets = [0, 0, 88], sizes = [2, 8, 8], strides = [1, 1, 1]} : vector<2x8x96xbf16> to vector<2x8x8xbf16>
    %51 = tpu.concatenate %47, %48, %49, %50 in 0 : vector<2x8x8xbf16>, vector<2x8x8xbf16>, vector<2x8x8xbf16>, vector<2x8x8xbf16> -> vector<8x8x8xbf16>
    "tpu.trace_start"() <{level = 10 : i32, message = "bqd,bkd->bqk"}> : () -> ()
    %cst_15 = arith.constant dense<0.000000e+00> : vector<8x8x8xf32>
    %52 = tpu.matmul %41, %46, %cst_15 {dimension_numbers = #tpu.dot_dimension_numbers<[2], [2], [1], [1], [0, 0, 0, 1, 1, 1], [0], [0]>} : vector<8x8x8xbf16>, vector<8x8x8xbf16>, vector<8x8x8xf32> -> vector<8x8x8xf32>
    "tpu.trace_stop"() : () -> ()
    %c0_16 = arith.constant 0 : index
    %c0_17 = arith.constant 0 : index
    %c0_18 = arith.constant 0 : index
    %53 = vector.load %arg2[%c0_16, %c0_17, %c0_18] : memref<2x1x8xf32, #tpu.memory_space<vmem>>, vector<2x1x8xf32>
    %54 = vector.shape_cast %52 : vector<8x8x8xf32> to vector<4x2x8x8xf32>
    %55 = vector.shape_cast %53 : vector<2x1x8xf32> to vector<1x2x1x8xf32>
    %56 = vector.broadcast %55 : vector<1x2x1x8xf32> to vector<4x2x8x8xf32>
    %57 = arith.addf %54, %56 : vector<4x2x8x8xf32>
    %58 = vector.shape_cast %57 : vector<4x2x8x8xf32> to vector<8x8x8xf32>
    %cst_19 = arith.constant dense<0xFF800000> : vector<8x8xf32>
    %59 = vector.multi_reduction <maximumf>, %58, %cst_19 [2] : vector<8x8x8xf32> to vector<8x8xf32>
    %60 = vector.shape_cast %59 : vector<8x8xf32> to vector<8x8x1xf32>
    %61 = vector.broadcast %60 : vector<8x8x1xf32> to vector<8x8x8xf32>
    %62 = arith.subf %58, %61 : vector<8x8x8xf32>
    %63 = math.exp %62 : vector<8x8x8xf32>
    %cst_20 = arith.constant dense<0.000000e+00> : vector<8x8xf32>
    %64 = vector.multi_reduction <add>, %63, %cst_20 [2] : vector<8x8x8xf32> to vector<8x8xf32>
    %65 = vector.shape_cast %64 : vector<8x8xf32> to vector<8x8x1xf32>
    %66 = tpu.reciprocal %65 {approx = true} : vector<8x8x1xf32> -> vector<8x8x1xf32>
    %67 = vector.broadcast %66 : vector<8x8x1xf32> to vector<8x8x8xf32>
    %68 = arith.mulf %63, %67 : vector<8x8x8xf32>
    %69 = arith.truncf %68 : vector<8x8x8xf32> to vector<8x8x8xbf16>
    "tpu.trace_start"() <{level = 10 : i32, message = "bqk,bkd->bqd"}> : () -> ()
    %cst_21 = arith.constant dense<0.000000e+00> : vector<8x8x8xf32>
    %70 = tpu.matmul %69, %51, %cst_21 {dimension_numbers = #tpu.dot_dimension_numbers<[2], [1], [1], [2], [0, 0, 0, 1, 1, 2], [0], [0]>} : vector<8x8x8xbf16>, vector<8x8x8xbf16>, vector<8x8x8xf32> -> vector<8x8x8xf32>
    "tpu.trace_stop"() : () -> ()
    %71 = arith.truncf %70 : vector<8x8x8xf32> to vector<8x8x8xbf16>
    %72 = vector.extract_strided_slice %71 {offsets = [0, 0, 0], sizes = [2, 8, 8], strides = [1, 1, 1]} : vector<8x8x8xbf16> to vector<2x8x8xbf16>
    %73 = vector.extract_strided_slice %71 {offsets = [2, 0, 0], sizes = [2, 8, 8], strides = [1, 1, 1]} : vector<8x8x8xbf16> to vector<2x8x8xbf16>
    %74 = vector.extract_strided_slice %71 {offsets = [4, 0, 0], sizes = [2, 8, 8], strides = [1, 1, 1]} : vector<8x8x8xbf16> to vector<2x8x8xbf16>
    %75 = vector.extract_strided_slice %71 {offsets = [6, 0, 0], sizes = [2, 8, 8], strides = [1, 1, 1]} : vector<8x8x8xbf16> to vector<2x8x8xbf16>
    %76 = tpu.concatenate %72, %73, %74, %75 in 2 : vector<2x8x8xbf16>, vector<2x8x8xbf16>, vector<2x8x8xbf16>, vector<2x8x8xbf16> -> vector<2x8x32xbf16>
    %77 = vector.shape_cast %76 : vector<2x8x32xbf16> to vector<16x32xbf16>
    %c0_22 = arith.constant 0 : index
    %c0_23 = arith.constant 0 : index
    %78 = vector.load %arg7[%c0_22, %c0_23] : memref<32x32xbf16, #tpu.memory_space<vmem>>, vector<32x32xbf16>
    %cst_24 = arith.constant dense<0.000000e+00> : vector<16x32xf32>
    %79 = tpu.matmul %77, %78, %cst_24 {dimension_numbers = #tpu.dot_dimension_numbers<[1], [0], [0], [1], [0, 0, 1, 1], [], []>} : vector<16x32xbf16>, vector<32x32xbf16>, vector<16x32xf32> -> vector<16x32xf32>
    %c0_25 = arith.constant 0 : index
    %c0_26 = arith.constant 0 : index
    %80 = vector.load %arg8[%c0_25, %c0_26] : memref<1x32xf32, #tpu.memory_space<vmem>>, vector<1x32xf32>
    %81 = vector.broadcast %80 : vector<1x32xf32> to vector<16x32xf32>
    %82 = arith.addf %79, %81 : vector<16x32xf32>
    %83 = vector.shape_cast %1 : vector<2x8x32xf32> to vector<16x32xf32>
    %84 = arith.addf %83, %82 : vector<16x32xf32>
    %cst_27 = arith.constant dense<0.000000e+00> : vector<16xf32>
    %85 = vector.multi_reduction <add>, %84, %cst_27 [1] : vector<16x32xf32> to vector<16xf32>
    %86 = vector.shape_cast %85 : vector<16xf32> to vector<16x1xf32>
    %cst_28 = arith.constant 3.200000e+01 : f32
    %87 = vector.broadcast %cst_28 : f32 to vector<16x1xf32>
    %88 = arith.divf %86, %87 : vector<16x1xf32>
    %89 = vector.broadcast %88 : vector<16x1xf32> to vector<16x32xf32>
    %90 = arith.subf %84, %89 : vector<16x32xf32>
    %91 = arith.mulf %90, %90 : vector<16x32xf32>
    %cst_29 = arith.constant dense<0.000000e+00> : vector<16xf32>
    %92 = vector.multi_reduction <add>, %91, %cst_29 [1] : vector<16x32xf32> to vector<16xf32>
    %93 = vector.shape_cast %92 : vector<16xf32> to vector<16x1xf32>
    %cst_30 = arith.constant 3.200000e+01 : f32
    %94 = vector.broadcast %cst_30 : f32 to vector<16x1xf32>
    %95 = arith.divf %93, %94 : vector<16x1xf32>
    %96 = vector.broadcast %88 : vector<16x1xf32> to vector<16x32xf32>
    %97 = arith.subf %84, %96 : vector<16x32xf32>
    %cst_31 = arith.constant 9.99999974E-6 : f32
    %98 = vector.broadcast %cst_31 : f32 to vector<16x1xf32>
    %99 = arith.addf %95, %98 : vector<16x1xf32>
    %100 = math.rsqrt %99 : vector<16x1xf32>
    %101 = vector.broadcast %100 : vector<16x1xf32> to vector<16x32xf32>
    %102 = arith.mulf %97, %101 : vector<16x32xf32>
    %c0_32 = arith.constant 0 : index
    %c0_33 = arith.constant 0 : index
    %103 = vector.load %arg9[%c0_32, %c0_33] : memref<1x32xf32, #tpu.memory_space<vmem>>, vector<1x32xf32>
    %104 = vector.broadcast %103 : vector<1x32xf32> to vector<16x32xf32>
    %105 = arith.mulf %102, %104 : vector<16x32xf32>
    %c0_34 = arith.constant 0 : index
    %c0_35 = arith.constant 0 : index
    %106 = vector.load %arg10[%c0_34, %c0_35] : memref<1x32xf32, #tpu.memory_space<vmem>>, vector<1x32xf32>
    %107 = vector.broadcast %106 : vector<1x32xf32> to vector<16x32xf32>
    %108 = arith.addf %105, %107 : vector<16x32xf32>
    %109 = arith.truncf %108 : vector<16x32xf32> to vector<16x32xbf16>
    %c0_36 = arith.constant 0 : index
    %c0_37 = arith.constant 0 : index
    %110 = vector.load %arg11[%c0_36, %c0_37] : memref<32x128xbf16, #tpu.memory_space<vmem>>, vector<32x128xbf16>
    %cst_38 = arith.constant dense<0.000000e+00> : vector<16x128xf32>
    %111 = tpu.matmul %109, %110, %cst_38 {dimension_numbers = #tpu.dot_dimension_numbers<[1], [0], [0], [1], [0, 0, 1, 1], [], []>} : vector<16x32xbf16>, vector<32x128xbf16>, vector<16x128xf32> -> vector<16x128xf32>
    %c0_39 = arith.constant 0 : index
    %c0_40 = arith.constant 0 : index
    %112 = vector.load %arg12[%c0_39, %c0_40] : memref<1x128xf32, #tpu.memory_space<vmem>>, vector<1x128xf32>
    %113 = vector.broadcast %112 : vector<1x128xf32> to vector<16x128xf32>
    %114 = arith.addf %111, %113 : vector<16x128xf32>
    %cst_41 = arith.constant 1.702000e+00 : f32
    %115 = vector.broadcast %cst_41 : f32 to vector<16x128xf32>
    %116 = arith.mulf %115, %114 : vector<16x128xf32>
    %117 = arith.negf %116 : vector<16x128xf32>
    %118 = math.exp %117 : vector<16x128xf32>
    %cst_42 = arith.constant 1.000000e+00 : f32
    %119 = vector.broadcast %cst_42 : f32 to vector<16x128xf32>
    %120 = arith.addf %119, %118 : vector<16x128xf32>
    %121 = arith.divf %119, %120 : vector<16x128xf32>
    %122 = arith.mulf %114, %121 : vector<16x128xf32>
    %123 = arith.truncf %122 : vector<16x128xf32> to vector<16x128xbf16>
    %c0_43 = arith.constant 0 : index
    %c0_44 = arith.constant 0 : index
    %124 = vector.load %arg13[%c0_43, %c0_44] : memref<128x32xbf16, #tpu.memory_space<vmem>>, vector<128x32xbf16>
    %cst_45 = arith.constant dense<0.000000e+00> : vector<16x32xf32>
    %125 = tpu.matmul %123, %124, %cst_45 {dimension_numbers = #tpu.dot_dimension_numbers<[1], [0], [0], [1], [0, 0, 1, 1], [], []>} : vector<16x128xbf16>, vector<128x32xbf16>, vector<16x32xf32> -> vector<16x32xf32>
    %c0_46 = arith.constant 0 : index
    %c0_47 = arith.constant 0 : index
    %126 = vector.load %arg14[%c0_46, %c0_47] : memref<1x32xf32, #tpu.memory_space<vmem>>, vector<1x32xf32>
    %127 = vector.broadcast %126 : vector<1x32xf32> to vector<16x32xf32>
    %128 = arith.addf %125, %127 : vector<16x32xf32>
    %129 = arith.addf %84, %128 : vector<16x32xf32>
    %130 = vector.shape_cast %129 : vector<16x32xf32> to vector<2x8x32xf32>
    %131 = arith.truncf %130 : vector<2x8x32xf32> to vector<2x8x32xbf16>
    %c0_48 = arith.constant 0 : index
    %c0_49 = arith.constant 0 : index
    %c0_50 = arith.constant 0 : index
    %132 = vector.load %arg15[%c0_48, %c0_49, %c0_50] : memref<2x8x32xbf16, #tpu.memory_space<vmem>>, vector<2x8x32xbf16>
    tpu.vector_store %arg15[%c0_48, %c0_49, %c0_50], %131 {strides = array<i32>} : memref<2x8x32xbf16, #tpu.memory_space<vmem>>, vector<2x8x32xbf16>,
    return
  }
  func.func @transform_0(%arg0: i32) -> (i32, i32, i32) {
    %c0_i32 = arith.constant 0 : i32
    %c0_i32_0 = arith.constant 0 : i32
    %c0_i32_1 = arith.constant 0 : i32
    return %arg0, %c0_i32, %c0_i32_0 : i32, i32, i32
  }
  func.func @transform_1(%arg0: i32) -> (i32, i32, i32) {
    %c0_i32 = arith.constant 0 : i32
    %c0_i32_0 = arith.constant 0 : i32
    %c0_i32_1 = arith.constant 0 : i32
    return %arg0, %c0_i32, %c0_i32_0 : i32, i32, i32
  }
  func.func @transform_2(%arg0: i32) -> (i32, i32) {
    %c0_i32 = arith.constant 0 : i32
    %c0_i32_0 = arith.constant 0 : i32
    %c0_i32_1 = arith.constant 0 : i32
    return %c0_i32, %c0_i32_0 : i32, i32
  }
  func.func @transform_3(%arg0: i32) -> (i32, i32) {
    %c0_i32 = arith.constant 0 : i32
    %c0_i32_0 = arith.constant 0 : i32
    %c0_i32_1 = arith.constant 0 : i32
    return %c0_i32, %c0_i32_0 : i32, i32
  }
  func.func @transform_4(%arg0: i32) -> (i32, i32) {
    %c0_i32 = arith.constant 0 : i32
    %c0_i32_0 = arith.constant 0 : i32
    %c0_i32_1 = arith.constant 0 : i32
    return %c0_i32, %c0_i32_0 : i32, i32
  }
  func.func @transform_5(%arg0: i32) -> (i32, i32) {
    %c0_i32 = arith.constant 0 : i32
    %c0_i32_0 = arith.constant 0 : i32
    %c0_i32_1 = arith.constant 0 : i32
    return %c0_i32, %c0_i32_0 : i32, i32
  }
  func.func @transform_6(%arg0: i32) -> (i32, i32) {
    %c0_i32 = arith.constant 0 : i32
    %c0_i32_0 = arith.constant 0 : i32
    %c0_i32_1 = arith.constant 0 : i32
    return %c0_i32, %c0_i32_0 : i32, i32
  }
  func.func @transform_7(%arg0: i32) -> (i32, i32) {
    %c0_i32 = arith.constant 0 : i32
    %c0_i32_0 = arith.constant 0 : i32
    %c0_i32_1 = arith.constant 0 : i32
    return %c0_i32, %c0_i32_0 : i32, i32
  }
  func.func @transform_8(%arg0: i32) -> (i32, i32) {
    %c0_i32 = arith.constant 0 : i32
    %c0_i32_0 = arith.constant 0 : i32
    %c0_i32_1 = arith.constant 0 : i32
    return %c0_i32, %c0_i32_0 : i32, i32
  }
  func.func @transform_9(%arg0: i32) -> (i32, i32) {
    %c0_i32 = arith.constant 0 : i32
    %c0_i32_0 = arith.constant 0 : i32
    %c0_i32_1 = arith.constant 0 : i32
    return %c0_i32, %c0_i32_0 : i32, i32
  }
  func.func @transform_10(%arg0: i32) -> (i32, i32) {
    %c0_i32 = arith.constant 0 : i32
    %c0_i32_0 = arith.constant 0 : i32
    %c0_i32_1 = arith.constant 0 : i32
    return %c0_i32, %c0_i32_0 : i32, i32
  }
  func.func @transform_11(%arg0: i32) -> (i32, i32) {
    %c0_i32 = arith.constant 0 : i32
    %c0_i32_0 = arith.constant 0 : i32
    %c0_i32_1 = arith.constant 0 : i32
    return %c0_i32, %c0_i32_0 : i32, i32
  }
  func.func @transform_12(%arg0: i32) -> (i32, i32) {
    %c0_i32 = arith.constant 0 : i32
    %c0_i32_0 = arith.constant 0 : i32
    %c0_i32_1 = arith.constant 0 : i32
    return %c0_i32, %c0_i32_0 : i32, i32
  }
  func.func @transform_13(%arg0: i32) -> (i32, i32) {
    %c0_i32 = arith.constant 0 : i32
    %c0_i32_0 = arith.constant 0 : i32
    %c0_i32_1 = arith.constant 0 : i32
    return %c0_i32, %c0_i32_0 : i32, i32
  }
  func.func @transform_14(%arg0: i32) -> (i32, i32, i32) {
    %c0_i32 = arith.constant 0 : i32
    %c0_i32_0 = arith.constant 0 : i32
    %c0_i32_1 = arith.constant 0 : i32
    return %arg0, %c0_i32, %c0_i32_0 : i32, i32, i32
  }
}

</mosaic_0001>

<bundles_post_ra>
// kernel: tpu_custom_call.1
= control target key start
LH: loop header
LB: loop body
LE: loop exit
PB: predicated region body
PF: predicated region fallthrough
CT: control target
= control target key end

     0   :  { %6 = vsyncpa [#allocation3], 0  ;;  %s340_s0 = inlined_call_operand.hbm [shape: f32[8,128], index: 0, kind: input, shape index: {}]   ;;  %s341_s1 = inlined_call_operand.hbm [shape: f32[8,128], index: 1, kind: output, shape index: {}]  }
   0x1   :  { %7 = vsyncpa [#allocation4], 0  ;;  %s261_s6 = smov 0  }
   0x2 LB: > { %s144_s7 = sadd.s32 4294967295, %s247_s6   ;;  %p145_p0 = scmp.ge.s32.totalorder %s247_s6, 1  ;;  %s247_s6 = sphi %s261_s6, %s13_s6  }
   0x3   : > { %p60_p1 = scmp.lt.s32.totalorder %s247_s6, 3  ;;  %p275_p3 = scmp.eq.s32.totalorder %s144_s7, 0 }
   0x4   : > { %s249_s10 = smov [#allocation2]   ;;  %s179_s15 = scalar_lea.hbm %s340_s0, 128 }
   0x5   : > { %p269_p2 = pnand %p145_p0, %p60_p1  ;;  %s73_s11 = sshll.u32 %s249_s10, 4  ;;  %s74_s11 = int_to_ptr.vmem [resolvable:$true] %s73_s11 }
   0x6   : > { %s346_s9 = scalar_select %p275_p3, 1, 0 }
   0x7   : > { %s345_s8 = scalar_select %p269_p2, 1, 0 }
   0x8   : > { %p161_p4 = pneg %p269_p2  ;;  %p180_p6 = scmp.ne.s32.totalorder %s340_s0, %s179_s15 }
   0x9   : > { %p186_p10 = scmp.lt.u32.totalorder %s179_s15, %s340_s0 }
   0xa   : > { %p283_p5 = pnand %p275_p3, %p161_p4 }
   0xc   : > { %p181_p7 = pneg %p283_p5 }
   0xe   : > { %p182_p8 = pnand %p181_p7, %p180_p6 }
  0x10   : > { %p183_p9 = pneg %p182_p8 }
  0x12   : > { %p188_p11 = pnand %p186_p10, %p183_p9 }
  0x14   : > { %191 = shalt.err (!%p188_p11)
}
  0x15   : > { %s192_s20 = scalar_lea.vmem %s74_s11, 128  ;;  %p200_p1 = scmp.lt.s32.totalorder %s74_s11, %s74_s11 }
  0x16   : > { %p193_p12 = scmp.ne.s32.totalorder %s74_s11, %s192_s20  ;;  %p201_p4 = scmp.lt.s32.totalorder %s192_s20, %s192_s20 }
  0x18   : > { %p195_p13 = pnand %p193_p12, %p181_p7  ;;  %p202_p3 = por %p201_p4, %p200_p1 }
  0x1a   : > { %p196_p0 = pneg %p195_p13 }
  0x1c   : > { %p203_p2 = pnand %p202_p3, %p196_p0 }
  0x1e   : > { %206 = shalt.err (!%p203_p2)
}
  0x1f   : > { %164 = dma.hbm_to_vmem [thread:$0]  (!%p283_p5), %s340_s0, 128, %s74_s11, [#allocation3]  }
  0x20   : > { %p348_p6 = scmp.ne.s32.totalorder %s345_s8, 0 }
  0x21   : > { %p349_p8 = scmp.ne.s32.totalorder (!%p348_p6), %s346_s9, 0 }
  0x22   : > { %86 = sbr.rel (%p348_p6) target bundleno = 67 (0x43), region = 24 }
  0x29   : > { %238 = dma.done.wait (%p349_p8), [#allocation3], 128  }
  0x2a   : > { %240 = vsyncadd (%p349_p8), [#allocation3], 4294967168  ;;  %s250_s23 = smov [#allocation5]   ;;  %p311_p2 = scmp.eq.s32.totalorder %s144_s7, 1  ;;  %v96_v0 = vld [vmem:[#allocation2] sm:$0xff] }
  0x2b   : > { %s105_s24 = sshll.u32 %s250_s23, 4  ;;  %97 = vst [vmem:[#allocation5] sm:$0xff] %v96_v0  ;;  %s106_s24 = int_to_ptr.vmem [resolvable:$true] %s105_s24 }
  0x2c   : > { %s207_s26 = scalar_lea.vmem %s106_s24, 128  ;;  %p214_p9 = scmp.lt.s32.totalorder %s106_s24, %s106_s24 }
  0x2d   : > { %p208_p3 = scmp.ne.s32.totalorder %s106_s24, %s207_s26  ;;  %p215_p10 = scmp.lt.s32.totalorder %s207_s26, %s207_s26 }
  0x2f   : > { %p209_p5 = pnand %p208_p3, %p311_p2  ;;  %p216_p11 = por %p215_p10, %p214_p9 }
  0x31   : > { %p210_p7 = pneg %p209_p5 }
  0x33   : > { %p217_p12 = pnand %p216_p11, %p210_p7 }
  0x35   : > { %220 = shalt.err (!%p217_p12)
}
  0x36   : > { %s221_s29 = scalar_lea.hbm %s341_s1, 128 }
  0x37   : > { %p222_p13 = scmp.ne.s32.totalorder %s341_s1, %s221_s29  ;;  %p227_p4 = scmp.lt.u32.totalorder %s221_s29, %s341_s1 }
  0x39   : > { %p223_p0 = pnand %p222_p13, %p311_p2 }
  0x3b   : > { %p224_p1 = pneg %p223_p0 }
  0x3d   : > { %p229_p6 = pnand %p227_p4, %p224_p1 }
  0x3f   : > { %232 = shalt.err (!%p229_p6)
}
  0x40   : > { %158 = dma.vmem_to_hbm [thread:$0]  (%p311_p2), %s106_s24, 128, %s341_s1, [#allocation4]  }
  0x41   : > { %242 = dma.done.wait (%p311_p2), [#allocation4], 128  }
  0x42   : > { %244 = vsyncadd (%p311_p2), [#allocation4], 4294967168 }
  0x43 PF: > { %s13_s6 = sadd.s32 1, %s247_s6  }
  0x44   : > { %p10_p8 = scmp.ge.s32.totalorder %s13_s6, 4  }
  0x46   :  { %12 = sbr.rel (!%p10_p8) target bundleno = 2 (0x2), region = 53 }
  0x4d   :  { %118 = vsyncpa [#allocation3], 1 }
  0x4e   :  { %120 = vsyncpa [#allocation3 + $0x1], 1 }
  0x4f   :  { %121 = vsyncpa [#allocation4], 1 }
  0x50   :  { %123 = vsyncpa [#allocation4 + $0x1], 1 }

// kernel: _forward_layers.3
= control target key start
LH: loop header
LB: loop body
LE: loop exit
PB: predicated region body
PF: predicated region fallthrough
CT: control target
= control target key end

     0   :  { %s2915_s0 = inlined_call_operand.vmem [shape: bf16[4,8,32], index: 0, kind: input, shape index: {}]   ;;  %s2916_s1 = inlined_call_operand.vmem [shape: f32[4,1,8], index: 1, kind: input, shape index: {}]   ;;  %s2917_s2 = inlined_call_operand.vmem [shape: f32[1,32], index: 2, kind: input, shape index: {}]   ;;  %s2918_s3 = inlined_call_operand.vmem [shape: f32[1,32], index: 3, kind: input, shape index: {}]   ;;  %s2919_s4 = inlined_call_operand.vmem [shape: bf16[32,96], index: 4, kind: input, shape index: {}]   ;;  %s2920_s5 = inlined_call_operand.vmem [shape: f32[1,96], index: 5, kind: input, shape index: {}]   ;;  %s2921_s6 = inlined_call_operand.vmem [shape: bf16[32,32], index: 6, kind: input, shape index: {}]   ;;  %s2922_s7 = inlined_call_operand.vmem [shape: f32[1,32], index: 7, kind: input, shape index: {}]   ;;  %s2923_s8 = inlined_call_operand.vmem [shape: f32[1,32], index: 8, kind: input, shape index: {}]   ;;  %s2924_s9 = inlined_call_operand.vmem [shape: f32[1,32], index: 9, kind: input, shape index: {}]   ;;  %s2925_s10 = inlined_call_operand.vmem [shape: bf16[32,128], index: 10, kind: input, shape index: {}]   ;;  %s2926_s11 = inlined_call_operand.vmem [shape: f32[1,128], index: 11, kind: input, shape index: {}]   ;;  %s2927_s12 = inlined_call_operand.vmem [shape: bf16[128,32], index: 12, kind: input, shape index: {}]   ;;  %s2928_s13 = inlined_call_operand.vmem [shape: f32[1,32], index: 13, kind: input, shape index: {}]   ;;  %s2929_s14 = inlined_call_operand.hbm [shape: bf16[4,8,32], index: 14, kind: output, shape index: {}]  }
   0x1   :  { %2931 = sst [smem:[#allocation5_spill]] %s2915_s0 }
   0x2   :  { %2932 = sst [smem:[#allocation6_spill]] %s2916_s1 }
   0x3   :  { %2933 = sst [smem:[#allocation7_spill]] %s2917_s2 }
   0x4   :  { %19 = vsyncpa [#allocation3], 0 }
   0x5   :  { %21 = vsyncpa [#allocation3 + $0x1], 0  ;;  %s2477_s29 = smov 0   ;;  %s2479_s30 = smov 0  }
   0x6   :  { %s2481_s15 = smov 0   ;;  %s2483_s16 = smov 0  }
   0x7 LB: > { %s2498_s17 = sadd.s32 4294967295, %s2388_s16   ;;  %s1960_s18 = sadd.s32 4294967294, %s2388_s16   ;;  %s2388_s16 = sphi %s2483_s16, %s2943_s16   ;;  %s2384_s15 = sphi %s2481_s15, %s2942_s15   ;;  %s2380_s30 = sphi %s2479_s30, %s2941_s30   ;;  %s2376_s29 = sphi %s2477_s29, %s2940_s29  }
   0x8   : > { %s2502_s19 = sadd.s32 1, %s2388_s16   ;;  %s338_s20 = sadd.s32 1, %s2384_s15 }
   0x9   : > { %s335_s21 = ssub.s32 %s2388_s16, %s2502_s19  ;;  %p348_p0 = scmp.ne.s32.totalorder %s2384_s15, %s2380_s30 }
   0xa   : > { %p336_p1 = scmp.eq.s32.totalorder %s335_s21, 0  ;;  %p349_p2 = scmp.eq.s32.totalorder %s2498_s17, 1 }
   0xb   : > { %p354_p3 = scmp.ne.s32.totalorder %s2380_s30, %s2376_s29  ;;  %p355_p4 = scmp.eq.s32.totalorder %s1960_s18, 1 }
   0xc   : > { %s2513_s22 = scalar_select %p336_p1, %s2384_s15, %s338_s20  }
   0xd   : > { %p2515_p5 = por %p349_p2, %p348_p0  ;;  %p2519_p6 = por %p355_p4, %p354_p3 }
   0xe   : > { %p1963_p7 = scmp.ge.s32.totalorder %s2388_s16, 1  ;;  %p426_p8 = scmp.lt.s32.totalorder %s2388_s16, 3 }
  0x10   : > { %p427_p9 = pnand %p1963_p7, %p426_p8 }
  0x11   : > { %s1965_s25 = sshll.u32 (!%p427_p9), %s2498_s17, 1  ;;  %s2936_s0 = sld [smem:[#allocation5_spill]] (!%p427_p9)  ;;  %vm493_vm0 = vcmask (!%p427_p9), 261120   ;;  %v2264_v15 = vld [vmem:[%s2919_s4] sm:$0xff] (!%p427_p9)   ;;  %v2390_v16 = vmov (!%p427_p9), 0.0   ;;  %v2265_v17 = vld [vmem:[%s2919_s4 + $0x8] sm:$0xff] (!%p427_p9)  }
  0x12   : > { %430 = sbr.rel (%p427_p9) target bundleno = 2751 (0xabf), region = 76  ;;  %p477_p10 = scmp.lt.s32.totalorder (!%p427_p9), %s1965_s25, 3  ;;  %2074 = vmatprep.subr.bf16.mxu0 (!%p427_p9), %v2390_v16  ;;  %2094 = vmatprep.subr.bf16.mxu1 (!%p427_p9), %v2390_v16  ;;  %vm2391_vm1 = vmmov (!%p427_p9), 0   ;;  %v1969_v30 = vld [vmem:[%s2918_s3] ss:$0 sm:$0xff] (!%p427_p9)  ;;  %vm625_vm2 = vcmask (!%p427_p9), 64512  }
  0x13   : > { %2075 = vmatpush3.bf16.msra.mxu0 (!%p427_p9), %v2264_v15  ;;  %2078 = vmatprep.mubr.msk.bf16.mxu0 (!%p427_p9), %vm2391_vm1, %v2390_v16  ;;  %s2937_s2 = sld [smem:[#allocation7_spill]] (!%p427_p9)  ;;  %v1970_v35 = vld [vmem:[%s2920_s5] ss:$0 sm:$0xff] (!%p427_p9)  ;;  %s2392_s28 = smov (!%p427_p9), 120   ;;  %vm1131_vm3 = vcmask (!%p427_p9), 1043456   ;;  %vm1543_vm4 = vcmask (!%p427_p9), 130048  }
  0x14   : > { %2076 = vmatprep.subr.bf16.mxu0 (!%p427_p9), %v2390_v16  ;;  %2096 = vmatprep.mubr.msk.bf16.mxu1 (!%p427_p9), %vm2391_vm1, %v2390_v16  ;;  %s2394_s20 = smov (!%p427_p9), 112   ;;  %s2395_s21 = smov (!%p427_p9), 96   ;;  %vm1548_vm5 = vcmask (!%p427_p9), 195584   ;;  %vm1872_vm6 = vcmask (!%p427_p9), 257024  }
  0x15   : > { %s2938_s1 = sld [smem:[#allocation6_spill]] (!%p427_p9)  ;;  %s2400_s27 = smov (!%p427_p9), [#allocation2]  }
  0x17   : > { %2077 = vmatpush3.bf16.msra.mxu0 (!%p427_p9), %v2265_v17 }
  0x18   : > { %2082 = vmatprep.subr.bf16.mxu0 (!%p427_p9), %v2390_v16 }
  0x19   : > { %s2945_s25 = smov (!%p477_p10, %s1965_s25), 3  ;;  %v1968_v26 = vld [vmem:[%s2937_s2] ss:$0 sm:$0xff]  ;;  %s2330_s2 = sshll.u32 %s2400_s27, 4  ;;  %s2331_s2 = int_to_ptr.vmem [resolvable:$false] %s2330_s2 }
  0x1a   : > { %s1966_s26 = sshll.u32 %s2945_s25, 2 }
  0x1b   : > { %s480_s18 = scalar_lea.vmem %s2936_s0, %s1966_s26  ;;  %s473_s0 = sand.u32 1, %s2380_s30  }
  0x1c   : > { %v2021_v0 = vld [vmem:[%s480_s18] sm:$0xff]   ;;  %s2393_s18 = smov 104  }
  0x1d   : > { %v2532_v1 = vunpack.c.l.bf16 %v2021_v0  ;;  %v2534_v2 = vunpack.c.h.bf16 %v2021_v0 }
  0x1f   : > { %v494_v3 = vsel %vm493_vm0, %v2532_v1, 0.0  ;;  %v497_v4 = vsel %vm493_vm0, %v2534_v2, 0.0 }
  0x20   : > { %495 = vadd.xlane.f32.xlu0 %v494_v3 }
  0x24   : > { %498 = vadd.xlane.f32.xlu0 %v497_v4 }
  0xad   : > { %v496_v5 = vpop.xlane.xlu0 %495 }
  0xae   : > { %v501_v6 = vmul.f32 0.03125, %v496_v5 }
  0xb0   : > { %v503_v7 = vsub.f32 %v2532_v1, %v501_v6 }
  0xb1   : > { %v499_v8 = vpop.xlane.xlu0 %498 }
  0xb2   : > { %v502_v9 = vmul.f32 0.03125, %v499_v8  ;;  %v505_v10 = vmul.f32 %v503_v7, %v503_v7 }
  0xb4   : > { %v504_v11 = vsub.f32 %v2534_v2, %v502_v9  ;;  %v507_v12 = vsel %vm493_vm0, %v505_v10, 0.0 }
  0xb5   : > { %508 = vadd.xlane.f32.xlu1 %v507_v12 }
  0xb6   : > { %v506_v13 = vmul.f32 %v504_v11, %v504_v11 }
  0xb8   : > { %v510_v14 = vsel %vm493_vm0, %v506_v13, 0.0 }
  0xb9   : > { %511 = vadd.xlane.f32.xlu1 %v510_v14 }
 0x142   : > { %v509_v18 = vpop.xlane.xlu1 %508 }
 0x143   : > { %v513_v19 = vmul.f32 0.03125, %v509_v18 }
 0x145   : > { %v515_v20 = vadd.f32 1e-05, %v513_v19 }
 0x146   : > { %v512_v21 = vpop.xlane.xlu1 %511 }
 0x147   : > { %2278 = vrsqrt.f32 %v515_v20  ;;  %v514_v22 = vmul.f32 0.03125, %v512_v21 }
 0x149   : > { %v516_v23 = vadd.f32 1e-05, %v514_v22 }
 0x14b   : > { %2280 = vrsqrt.f32 %v516_v23 }
 0x151   : > { %v2279_v24 = vpop.eup %2278 }
 0x152   : > { %v519_v25 = vmul.f32 %v2279_v24, %v503_v7 }
 0x154   : > { %v528_v29 = vmul.f32 %v1968_v26, %v519_v25 }
 0x155   : > { %v2281_v27 = vpop.eup %2280 }
 0x156   : > { %v520_v28 = vmul.f32 %v2281_v27, %v504_v11  ;;  %v537_v32 = vadd.f32 %v1969_v30, %v528_v29 }
 0x158   : > { %v529_v31 = vmul.f32 %v1968_v26, %v520_v28 }
 0x15a   : > { %v538_v33 = vadd.f32 %v1969_v30, %v529_v31 }
 0x15c   : > { %v539_v34 = vpack.c.bf16 %v538_v33, %v537_v32 }
 0x15e   : > { %2079 = vmatmul.mubr.msk.bf16.vlgmr.msra.gmra.mrb[0].mxu0 %vm493_vm0, %v539_v34 }
 0x15f   : > { %2084 = vmatprep.mubr.msk.bf16.mxu0 %vm2391_vm1, %v2390_v16 }
 0x231   : > { %v600_v36 = vpop.f32.mrb[0].mxu0 }
 0x232   : > { %v601_v37 = vadd.f32 %v1970_v35, %v600_v36  ;;  %v2080_v38 = vpop.f32.mrb[1].mxu0 }
 0x233   : > { %v603_v39 = vpop.f32.mrb[2].mxu0 }
 0x234   : > { %v2570_v40 = vpack.c.bf16 %v601_v37, %v601_v37  ;;  %v604_v41 = vadd.f32 %v1970_v35, %v603_v39  ;;  %v2081_v42 = vpop.f32.mrb[3].mxu0 }
 0x236   : > { %v2572_v43 = vpack.c.bf16 %v604_v41, %v604_v41  ;;  %611 = vrot.lane.b32.xlu0 %v2570_v40, %s2392_s28 }
 0x238   : > { %613 = vrot.lane.b32.xlu1 %v2572_v43, %s2392_s28  ;;  %s485_s28 = scalar_lea.vmem %s2938_s1, %s2945_s25  ;;  %s2930_s25 = smov 64  }
 0x239   : > { %v1982_v4 = vld [vmem:[%s485_s28] ss:$0 sm:$0xff]  ;;  %v1983_v11 = vld [vmem:[%s485_s28 + $0x1] ss:$0 sm:$0xff]  ;;  %s2332_s1 = scalar_lea.vmem %s2331_s2, 256 }
 0x23a   : > { %619 = vrot.lane.b32.xlu0 %v2570_v40, %s2393_s18 }
 0x23c   : > { %615 = vrot.lane.b32.xlu1 %v2570_v40, %s2394_s20 }
 0x23e   : > { %623 = vrot.lane.b32.xlu0 %v2570_v40, %s2395_s21 }
 0x240   : > { %617 = vrot.lane.b32.xlu1 %v2572_v43, %s2394_s20  ;;  %s2398_s20 = smov 16  }
 0x244   : > { %621 = vrot.lane.b32.xlu1 %v2572_v43, %s2393_s18  ;;  %s2397_s18 = smov 8  }
 0x248   : > { %672 = vrot.lane.b32.xlu1 %v2572_v43, %s2395_s21 }
 0x2a8   : > { %v2582_v44 = vpop.permute.xlu0 %611 }
 0x2a9   : > { %720 = vrot.lane.b32.xlu0 %v2582_v44, %s2395_s21 }
 0x2aa   : > { %v2585_v45 = vpop.permute.xlu1 %613 }
 0x2ab   : > { %768 = vrot.lane.b32.xlu1 %v2585_v45, %s2395_s21 }
 0x2ac   : > { %v2588_v46 = vpop.permute.xlu0 %619 }
 0x2ae   : > { %v2590_v47 = vpop.permute.xlu1 %615 }
 0x2af   : > { %816 = vrot.lane.b32.xlu0 %v2590_v47, %s2395_s21 }
 0x2b0   : > { %v624_v48 = vpop.permute.xlu0 %623 }
 0x2b1   : > { %v630_v49 = vsel %vm625_vm2, %v624_v48, 0 }
 0x2b2   : > { %2083 = vmatpush3.bf16.xpose.msra.mxu0 %v630_v49  ;;  %v2594_v50 = vpop.permute.xlu1 %617 }
 0x2b3   : > { %912 = vrot.lane.b32.xlu0 %v2588_v46, %s2395_s21  ;;  %864 = vrot.lane.b32.xlu1 %v2594_v50, %s2395_s21 }
 0x2b4   : > { %2088 = vmatprep.subr.bf16.mxu0 %v2390_v16 }
 0x2b6   : > { %v2599_v51 = vpop.permute.xlu1 %621 }
 0x2b7   : > { %960 = vrot.lane.b32.xlu1 %v2599_v51, %s2395_s21  ;;  %s1964_s21 = sshll.u32 %s473_s0, 3 }
 0x2b8   : > { %s475_s28 = scalar_lea.vmem [#allocation2], %s1964_s21 }
 0x2b9   : > { %2085 = vmatmul.mubr.msk.bf16.vlgmr.msra.gmra.mrb[4].mxu0 %vm625_vm2, %v2570_v40 }
 0x2ba   : > { %v673_v52 = vpop.permute.xlu1 %672  ;;  %2090 = vmatprep.mubr.msk.bf16.mxu0 %vm2391_vm1, %v2390_v16 }
 0x2bb   : > { %v678_v53 = vsel %vm625_vm2, %v673_v52, 0 }
 0x2bc   : > { %2089 = vmatpush3.bf16.xpose.msra.mxu0 %v678_v53 }
 0x2bd   : > { %2100 = vmatprep.subr.bf16.mxu0 %v2390_v16 }
 0x2c3   : > { %2091 = vmatmul.mubr.msk.bf16.vlgmr.msra.gmra.mrb[8].mxu0 %vm625_vm2, %v2572_v43 }
 0x2c4   : > { %2102 = vmatprep.mubr.msk.bf16.mxu0 %vm2391_vm1, %v2390_v16 }
 0x31b   : > { %v721_v54 = vpop.permute.xlu0 %720 }
 0x31c   : > { %v726_v55 = vsel %vm625_vm2, %v721_v54, 0 }
 0x31d   : > { %2095 = vmatpush3.bf16.xpose.msra.mxu1 %v726_v55  ;;  %v769_v56 = vpop.permute.xlu1 %768 }
 0x31e   : > { %v774_v57 = vsel %vm625_vm2, %v769_v56, 0  ;;  %2106 = vmatprep.subr.bf16.mxu1 %v2390_v16 }
 0x31f   : > { %2101 = vmatpush3.bf16.xpose.msra.mxu0 %v774_v57 }
 0x320   : > { %2112 = vmatprep.subr.bf16.mxu0 %v2390_v16 }
 0x321   : > { %v817_v58 = vpop.permute.xlu0 %816 }
 0x322   : > { %v822_v59 = vsel %vm625_vm2, %v817_v58, 0 }
 0x324   : > { %2097 = vmatmul.mubr.msk.bf16.vlgmr.msra.gmra.mrb[0].mxu1 %vm625_vm2, %v2582_v44 }
 0x325   : > { %2107 = vmatpush3.bf16.xpose.msra.mxu1 %v822_v59  ;;  %v865_v60 = vpop.permute.xlu1 %864  ;;  %2108 = vmatprep.mubr.msk.bf16.mxu1 %vm2391_vm1, %v2390_v16  ;;  %v913_v62 = vpop.permute.xlu0 %912 }
 0x326   : > { %v870_v61 = vsel %vm625_vm2, %v865_v60, 0  ;;  %2103 = vmatmul.mubr.msk.bf16.vlgmr.msra.gmra.mrb[12].mxu0 %vm625_vm2, %v2585_v45  ;;  %2118 = vmatprep.subr.bf16.mxu1 %v2390_v16  ;;  %v918_v0 = vsel %vm625_vm2, %v913_v62, 0 }
 0x327   : > { %2113 = vmatpush3.bf16.xpose.msra.mxu0 %v870_v61  ;;  %2114 = vmatprep.mubr.msk.bf16.mxu0 %vm2391_vm1, %v2390_v16 }
 0x328   : > { %2124 = vmatprep.subr.bf16.mxu0 %v2390_v16 }
 0x329   : > { %v961_v63 = vpop.permute.xlu1 %960 }
 0x32a   : > { %v966_v3 = vsel %vm625_vm2, %v961_v63, 0 }
 0x32c   : > { %2109 = vmatmul.mubr.msk.bf16.vlgmr.msra.gmra.mrb[4].mxu1 %vm625_vm2, %v2590_v47 }
 0x32d   : > { %2119 = vmatpush3.bf16.xpose.msra.mxu1 %v918_v0  ;;  %2120 = vmatprep.mubr.msk.bf16.mxu1 %vm2391_vm1, %v2390_v16 }
 0x32e   : > { %2115 = vmatmul.mubr.msk.bf16.vlgmr.msra.gmra.mrb[16].mxu0 %vm625_vm2, %v2594_v50  ;;  %2130 = vmatprep.subr.bf16.mxu1 %v2390_v16 }
 0x32f   : > { %2125 = vmatpush3.bf16.xpose.msra.mxu0 %v966_v3  ;;  %2126 = vmatprep.mubr.msk.bf16.mxu0 %vm2391_vm1, %v2390_v16 }
 0x330   : > { %2136 = vmatprep.subr.bf16.mxu0 %v2390_v16 }
 0x334   : > { %2121 = vmatmul.mubr.msk.bf16.vlgmr.msra.gmra.mrb[8].mxu1 %vm625_vm2, %v2588_v46 }
 0x335   : > { %2132 = vmatprep.mubr.msk.bf16.mxu1 %vm2391_vm1, %v2390_v16 }
 0x336   : > { %2127 = vmatmul.mubr.msk.bf16.vlgmr.msra.gmra.mrb[20].mxu0 %vm625_vm2, %v2599_v51 }
 0x337   : > { %2138 = vmatprep.mubr.msk.bf16.mxu0 %vm2391_vm1, %v2390_v16 }
 0x38c   : > { %v666_v5 = vpop.f32.mrb[4].mxu0 }
 0x38d   : > { %v1022_v6 = vadd.f32 %v1982_v4, %v666_v5  ;;  %v2086_v7 = vpop.f32.mrb[5].mxu0 }
 0x38e   : > { %v669_v8 = vpop.f32.mrb[6].mxu0 }
 0x38f   : > { %v2087_v9 = vpop.f32.mrb[7].mxu0  ;;  %v1030_v10 = vsel %vm625_vm2, %v1022_v6, -inf }
 0x390   : > { %1031 = vmax.xlane.f32.xlu0 %v1030_v10 }
 0x396   : > { %v714_v12 = vpop.f32.mrb[8].mxu0 }
 0x397   : > { %v1023_v13 = vadd.f32 %v1983_v11, %v714_v12  ;;  %v2092_v14 = vpop.f32.mrb[9].mxu0 }
 0x398   : > { %v717_v15 = vpop.f32.mrb[10].mxu0 }
 0x399   : > { %v2093_v17 = vpop.f32.mrb[11].mxu0  ;;  %v1033_v18 = vsel %vm625_vm2, %v1023_v13, -inf }
 0x39a   : > { %1034 = vmax.xlane.f32.xlu1 %v1033_v18 }
 0x3f7   : > { %v762_v19 = vpop.f32.mrb[0].mxu1 }
 0x3f8   : > { %v2654_v20 = vadd.f32 %v1982_v4, %v762_v19  ;;  %v2098_v21 = vpop.f32.mrb[1].mxu1 }
 0x3f9   : > { %v765_v22 = vpop.f32.mrb[2].mxu1  ;;  %v810_v23 = vpop.f32.mrb[12].mxu0 }
 0x3fa   : > { %v2656_v24 = vadd.f32 %v1983_v11, %v810_v23  ;;  %v2099_v25 = vpop.f32.mrb[3].mxu1  ;;  %v2104_v26 = vpop.f32.mrb[13].mxu0  ;;  %v1036_v27 = vsel %vm625_vm2, %v2654_v20, -inf }
 0x3fb   : > { %1037 = vmax.xlane.f32.xlu0 %v1036_v27  ;;  %v813_v28 = vpop.f32.mrb[14].mxu0 }
 0x3fc   : > { %v2105_v29 = vpop.f32.mrb[15].mxu0  ;;  %v1039_v30 = vsel %vm625_vm2, %v2656_v24, -inf }
 0x3ff   : > { %v858_v31 = vpop.f32.mrb[4].mxu1  ;;  %1040 = vmax.xlane.f32.xlu0 %v1039_v30 }
 0x400   : > { %v2662_v32 = vadd.f32 %v1982_v4, %v858_v31  ;;  %v2110_v33 = vpop.f32.mrb[5].mxu1 }
 0x401   : > { %v861_v34 = vpop.f32.mrb[6].mxu1  ;;  %v906_v35 = vpop.f32.mrb[16].mxu0 }
 0x402   : > { %v2664_v36 = vadd.f32 %v1983_v11, %v906_v35  ;;  %v2111_v37 = vpop.f32.mrb[7].mxu1  ;;  %v2116_v38 = vpop.f32.mrb[17].mxu0  ;;  %v1042_v39 = vsel %vm625_vm2, %v2662_v32, -inf }
 0x403   : > { %1043 = vmax.xlane.f32.xlu0 %v1042_v39  ;;  %v909_v41 = vpop.f32.mrb[18].mxu0 }
 0x404   : > { %v2117_v42 = vpop.f32.mrb[19].mxu0  ;;  %v1045_v48 = vsel %vm625_vm2, %v2664_v36, -inf }
 0x405   : > { %1046 = vmax.xlane.f32.xlu1 %v1045_v48 }
 0x407   : > { %v954_v49 = vpop.f32.mrb[8].mxu1 }
 0x408   : > { %v2670_v52 = vadd.f32 %v1982_v4, %v954_v49  ;;  %v2122_v53 = vpop.f32.mrb[9].mxu1 }
 0x409   : > { %v957_v54 = vpop.f32.mrb[10].mxu1  ;;  %v1002_v55 = vpop.f32.mrb[20].mxu0 }
 0x40a   : > { %v2123_v56 = vpop.f32.mrb[11].mxu1  ;;  %v2128_v57 = vpop.f32.mrb[21].mxu0  ;;  %v1048_v58 = vsel %vm625_vm2, %v2670_v52, -inf  ;;  %v1029_v0 = vadd.f32 %v1983_v11, %v1002_v55 }
 0x40b   : > { %1049 = vmax.xlane.f32.xlu0 %v1048_v58  ;;  %v1005_v59 = vpop.f32.mrb[22].mxu0 }
 0x40c   : > { %v2129_v60 = vpop.f32.mrb[23].mxu0  ;;  %v1051_v4 = vsel %vm625_vm2, %v1029_v0, -inf }
 0x416   : > { %1175 = vrot.lane.b32.xlu1 %v2572_v43, %s2930_s25 }
 0x41a   : > { %1223 = vrot.lane.b32.xlu1 %v2582_v44, %s2930_s25 }
 0x41d   : > { %v1032_v61 = vpop.xlane.xlu0 %1031 }
 0x41e   : > { %v1054_v62 = vsub.f32 %v1022_v6, %v1032_v61 }
 0x420   : > { %v1062_v63 = vmul.f32 1.442695, %v1054_v62 }
 0x421   : > { %1126 = vrot.lane.b32.xlu0 %v2570_v40, %s2930_s25 }
 0x422   : > { %2282 = vpow2.f32 %v1062_v63 }
 0x427   : > { %v1035_v43 = vpop.xlane.xlu1 %1034 }
 0x428   : > { %v1055_v44 = vsub.f32 %v1023_v13, %v1035_v43 }
 0x42a   : > { %v1064_v40 = vmul.f32 1.442695, %v1055_v44 }
 0x42c   : > { %v2680_v3 = vpop.eup %2282  ;;  %2284 = vpow2.f32 %v1064_v40 }
 0x42d   : > { %v1078_v5 = vsel %vm625_vm2, %v2680_v3, 0.0 }
 0x436   : > { %v2687_v6 = vpop.eup %2284 }
 0x437   : > { %v1081_v7 = vsel %vm625_vm2, %v2687_v6, 0.0 }
 0x43e   : > { %1052 = vmax.xlane.f32.xlu1 %v1051_v4 }
 0x440   : > { %1079 = vadd.xlane.f32.xlu0 %v1078_v5 }
 0x44f   : > { %1271 = vrot.lane.b32.xlu1 %v2585_v45, %s2930_s25 }
 0x473   : > { %1082 = vadd.xlane.f32.xlu1 %v1081_v7 }
 0x484   : > { %1367 = vrot.lane.b32.xlu1 %v2594_v50, %s2930_s25 }
 0x488   : > { %v1038_v8 = vpop.xlane.xlu0 %1037 }
 0x489   : > { %v1056_v9 = vsub.f32 %v2654_v20, %v1038_v8 }
 0x48b   : > { %v1066_v10 = vmul.f32 1.442695, %v1056_v9 }
 0x48c   : > { %v1041_v11 = vpop.xlane.xlu0 %1040 }
 0x48d   : > { %2286 = vpow2.f32 %v1066_v10  ;;  %v1057_v45 = vsub.f32 %v2656_v24, %v1041_v11 }
 0x48f   : > { %v1068_v14 = vmul.f32 1.442695, %v1057_v45 }
 0x490   : > { %v1044_v13 = vpop.xlane.xlu0 %1043 }
 0x491   : > { %2288 = vpow2.f32 %v1068_v14  ;;  %v1058_v28 = vsub.f32 %v2662_v32, %v1044_v13 }
 0x492   : > { %v1047_v12 = vpop.xlane.xlu1 %1046 }
 0x493   : > { %v1059_v15 = vsub.f32 %v2664_v36, %v1047_v12  ;;  %v1070_v29 = vmul.f32 1.442695, %v1058_v28 }
 0x495   : > { %v1072_v21 = vmul.f32 1.442695, %v1059_v15 }
 0x496   : > { %v1176_v17 = vpop.permute.xlu1 %1175 }
 0x497   : > { %v2696_v18 = vpop.eup %2286  ;;  %v1181_v19 = vsel %vm1131_vm3, %v1176_v17, 0  ;;  %2290 = vpow2.f32 %v1072_v21 }
 0x498   : > { %v1050_v50 = vpop.xlane.xlu0 %1049  ;;  %2137 = vmatpush3.bf16.msra.mxu0 %v1181_v19  ;;  %v1084_v20 = vsel %vm625_vm2, %v2696_v18, 0.0  ;;  %2292 = vpow2.f32 %v1070_v29 }
 0x499   : > { %1085 = vadd.xlane.f32.xlu0 %v1084_v20  ;;  %2148 = vmatprep.subr.bf16.mxu0 %v2390_v16  ;;  %v1060_v30 = vsub.f32 %v2670_v52, %v1050_v50 }
 0x49a   : > { %v1224_v33 = vpop.permute.xlu1 %1223 }
 0x49b   : > { %v2704_v24 = vpop.eup %2288  ;;  %v1074_v31 = vmul.f32 1.442695, %v1060_v30  ;;  %v1229_v53 = vsel %vm1131_vm3, %v1224_v33, 0 }
 0x49c   : > { %v1127_v22 = vpop.permute.xlu0 %1126  ;;  %v1087_v25 = vsel %vm625_vm2, %v2704_v24, 0.0 }
 0x49d   : > { %v1133_v23 = vsel %vm1131_vm3, %v1127_v22, 0  ;;  %2294 = vpow2.f32 %v1074_v31 }
 0x49e   : > { %2131 = vmatpush3.bf16.msra.mxu1 %v1133_v23 }
 0x49f   : > { %2142 = vmatprep.subr.bf16.mxu1 %v2390_v16 }
 0x4a1   : > { %v2708_v26 = vpop.eup %2290 }
 0x4a2   : > { %v1093_v27 = vsel %vm625_vm2, %v2708_v26, 0.0  ;;  %v2716_v34 = vpop.eup %2292 }
 0x4a3   : > { %v1090_v38 = vsel %vm625_vm2, %v2716_v34, 0.0 }
 0x4a7   : > { %v2720_v39 = vpop.eup %2294 }
 0x4a8   : > { %1088 = vadd.xlane.f32.xlu1 %v1087_v25  ;;  %v1096_v32 = vsel %vm625_vm2, %v2720_v39, 0.0 }
 0x4ac   : > { %1094 = vadd.xlane.f32.xlu1 %v1093_v27 }
 0x4af   : > { %1319 = vrot.lane.b32.xlu0 %v2590_v47, %s2930_s25 }
 0x4cb   : > { %v1053_v35 = vpop.xlane.xlu1 %1052 }
 0x4cc   : > { %v1061_v36 = vsub.f32 %v1029_v0, %v1053_v35 }
 0x4cd   : > { %v1080_v37 = vpop.xlane.xlu0 %1079 }
 0x4ce   : > { %v1076_v47 = vmul.f32 1.442695, %v1061_v36  ;;  %2296 = vrcp.f32 %v1080_v37  ;;  %1091 = vadd.xlane.f32.xlu0 %v1090_v38 }
 0x4cf   : > { %v1272_v54 = vpop.permute.xlu1 %1271 }
 0x4d0   : > { %2298 = vpow2.f32 %v1076_v47  ;;  %v1277_v59 = vsel %vm1131_vm3, %v1272_v54, 0  ;;  %v2266_v54 = vld [vmem:[%s2921_s6] sm:$0xff]  }
 0x4d2   : > { %1097 = vadd.xlane.f32.xlu0 %v1096_v32 }
 0x4d8   : > { %v2297_v41 = vpop.eup %2296 }
 0x4d9   : > { %v1110_v42 = vmul.f32 %v2297_v41, %v2680_v3 }
 0x4da   : > { %v2725_v48 = vpop.eup %2298 }
 0x4db   : > { %v1099_v49 = vsel %vm625_vm2, %v2725_v48, 0.0  ;;  %v1118_v52 = vpack.c.bf16 %v1110_v42, %v1110_v42 }
 0x4dc   : > { %1100 = vadd.xlane.f32.xlu1 %v1099_v49 }
 0x4dd   : > { %2133 = vmatmul.mubr.msk.bf16.vlgmr.msra.gmra.mrb[12].mxu1 %vm625_vm2, %v1118_v52 }
 0x4de   : > { %2143 = vmatpush3.bf16.msra.mxu1 %v1229_v53  ;;  %2144 = vmatprep.mubr.msk.bf16.mxu1 %vm2391_vm1, %v2390_v16 }
 0x4df   : > { %2154 = vmatprep.subr.bf16.mxu1 %v2390_v16 }
 0x4e8   : > { %1415 = vrot.lane.b32.xlu0 %v2588_v46, %s2930_s25 }
 0x4ed   : > { %1463 = vrot.lane.b32.xlu1 %v2599_v51, %s2930_s25  ;;  %s2019_s25 = sshll.u32 %s2498_s17, 7  ;;  %s2872_s17 = scalar_lea.sflag [#allocation3], %s473_s0 }
 0x4ee   : > { %s2868_s26 = scalar_lea.hbm %s2929_s14, %s2019_s25 }
 0x500   : > { %v1083_v55 = vpop.xlane.xlu1 %1082 }
 0x501   : > { %2300 = vrcp.f32 %v1083_v55 }
 0x504   : > { %v1368_v60 = vpop.permute.xlu1 %1367 }
 0x50b   : > { %v2301_v56 = vpop.eup %2300 }
 0x50c   : > { %v1111_v57 = vmul.f32 %v2301_v56, %v2687_v6  ;;  %v1373_v6 = vsel %vm1131_vm3, %v1368_v60, 0 }
 0x50e   : > { %v1119_v58 = vpack.c.bf16 %v1111_v57, %v1111_v57 }
 0x510   : > { %2139 = vmatmul.mubr.msk.bf16.vlgmr.msra.gmra.mrb[24].mxu0 %vm625_vm2, %v1119_v58 }
 0x511   : > { %2149 = vmatpush3.bf16.msra.mxu0 %v1277_v59  ;;  %2150 = vmatprep.mubr.msk.bf16.mxu0 %vm2391_vm1, %v2390_v16 }
 0x512   : > { %2160 = vmatprep.subr.bf16.mxu0 %v2390_v16 }
 0x526   : > { %v1086_v46 = vpop.xlane.xlu0 %1085 }
 0x527   : > { %2302 = vrcp.f32 %v1086_v46  ;;  %v2267_v46 = vld [vmem:[%s2921_s6 + $0x8] sm:$0xff]  }
 0x52a   : > { %v1320_v62 = vpop.permute.xlu0 %1319 }
 0x52b   : > { %v1325_v3 = vsel %vm1131_vm3, %v1320_v62, 0 }
 0x531   : > { %v2303_v51 = vpop.eup %2302 }
 0x532   : > { %v1112_v61 = vmul.f32 %v2303_v51, %v2696_v18 }
 0x534   : > { %v1120_v63 = vpack.c.bf16 %v1112_v61, %v1112_v61 }
 0x535   : > { %v1089_v0 = vpop.xlane.xlu1 %1088 }
 0x536   : > { %2304 = vrcp.f32 %v1089_v0  ;;  %2145 = vmatmul.mubr.msk.bf16.vlgmr.msra.gmra.mrb[16].mxu1 %vm625_vm2, %v1120_v63 }
 0x537   : > { %2155 = vmatpush3.bf16.msra.mxu1 %v1325_v3  ;;  %2156 = vmatprep.mubr.msk.bf16.mxu1 %vm2391_vm1, %v2390_v16 }
 0x538   : > { %2166 = vmatprep.subr.bf16.mxu1 %v2390_v16 }
 0x539   : > { %v1095_v4 = vpop.xlane.xlu1 %1094 }
 0x53a   : > { %2306 = vrcp.f32 %v1095_v4 }
 0x540   : > { %v2305_v5 = vpop.eup %2304 }
 0x541   : > { %v1113_v43 = vmul.f32 %v2305_v5, %v2704_v24 }
 0x543   : > { %v1121_v44 = vpack.c.bf16 %v1113_v43, %v1113_v43 }
 0x544   : > { %v2307_v40 = vpop.eup %2306 }
 0x545   : > { %2151 = vmatmul.mubr.msk.bf16.vlgmr.msra.gmra.mrb[28].mxu0 %vm625_vm2, %v1121_v44  ;;  %v1115_v7 = vmul.f32 %v2307_v40, %v2708_v26 }
 0x546   : > { %2161 = vmatpush3.bf16.msra.mxu0 %v1373_v6  ;;  %2162 = vmatprep.mubr.msk.bf16.mxu0 %vm2391_vm1, %v2390_v16 }
 0x547   : > { %2172 = vmatprep.subr.bf16.mxu0 %v2390_v16  ;;  %v1123_v8 = vpack.c.bf16 %v1115_v7, %v1115_v7 }
 0x54d   : > { %2163 = vmatmul.mubr.msk.bf16.vlgmr.msra.gmra.mrb[32].mxu0 %vm625_vm2, %v1123_v8 }
 0x54e   : > { %2174 = vmatprep.mubr.msk.bf16.mxu0 %vm2391_vm1, %v2390_v16 }
 0x55b   : > { %v1092_v9 = vpop.xlane.xlu0 %1091 }
 0x55c   : > { %2308 = vrcp.f32 %v1092_v9 }
 0x55f   : > { %v1098_v10 = vpop.xlane.xlu0 %1097 }
 0x560   : > { %2310 = vrcp.f32 %v1098_v10 }
 0x563   : > { %v1416_v12 = vpop.permute.xlu0 %1415 }
 0x564   : > { %v1421_v17 = vsel %vm1131_vm3, %v1416_v12, 0 }
 0x566   : > { %v2309_v11 = vpop.eup %2308 }
 0x567   : > { %v1114_v45 = vmul.f32 %v2309_v11, %v2716_v34 }
 0x569   : > { %v1101_v13 = vpop.xlane.xlu1 %1100  ;;  %v1122_v14 = vpack.c.bf16 %v1114_v45, %v1114_v45 }
 0x56a   : > { %v2311_v15 = vpop.eup %2310  ;;  %2312 = vrcp.f32 %v1101_v13 }
 0x56b   : > { %2157 = vmatmul.mubr.msk.bf16.vlgmr.msra.gmra.mrb[20].mxu1 %vm625_vm2, %v1122_v14  ;;  %v1116_v18 = vmul.f32 %v2311_v15, %v2720_v39 }
 0x56c   : > { %2167 = vmatpush3.bf16.msra.mxu1 %v1421_v17  ;;  %2168 = vmatprep.mubr.msk.bf16.mxu1 %vm2391_vm1, %v2390_v16 }
 0x56d   : > { %v1464_v19 = vpop.permute.xlu1 %1463  ;;  %2178 = vmatprep.subr.bf16.mxu1 %v2390_v16  ;;  %v1124_v20 = vpack.c.bf16 %v1116_v18, %v1116_v18 }
 0x56e   : > { %v1469_v50 = vsel %vm1131_vm3, %v1464_v19, 0  ;;  %v1992_v19 = vld [vmem:[%s2922_s7] ss:$0 sm:$0xff] }
 0x56f   : > { %2173 = vmatpush3.bf16.msra.mxu0 %v1469_v50 }
 0x570   : > { %2186 = vmatprep.subr.bf16.mxu0 %v2390_v16 }
 0x573   : > { %2169 = vmatmul.mubr.msk.bf16.vlgmr.msra.gmra.mrb[24].mxu1 %vm625_vm2, %v1124_v20 }
 0x574   : > { %v2313_v21 = vpop.eup %2312  ;;  %2182 = vmatprep.mubr.msk.bf16.mxu1 %vm2391_vm1, %v2390_v16  ;;  %2179 = vmatpush3.bf16.msra.mxu1 %v2266_v54  ;;  %v1997_v54 = vld [vmem:[%s2923_s8] ss:$0 sm:$0xff] }
 0x575   : > { %v1117_v22 = vmul.f32 %v2313_v21, %v2725_v48  ;;  %2180 = vmatprep.subr.bf16.mxu1 %v2390_v16 }
 0x577   : > { %v1125_v23 = vpack.c.bf16 %v1117_v22, %v1117_v22 }
 0x578   : > { %2181 = vmatpush3.bf16.msra.mxu1 %v2267_v46 }
 0x579   : > { %2175 = vmatmul.mubr.msk.bf16.vlgmr.msra.gmra.mrb[36].mxu0 %vm625_vm2, %v1125_v23  ;;  %2194 = vmatprep.subr.bf16.mxu1 %v2390_v16 }
 0x57a   : > { %2190 = vmatprep.mubr.msk.bf16.mxu0 %vm2391_vm1, %v2390_v16 }
 0x5b0   : > { %v2776_v24 = vpop.f32.mrb[12].mxu1 }
 0x5b1   : > { %v2134_v25 = vpop.f32.mrb[13].mxu1  ;;  %v1511_v8 = vpack.c.bf16 %v2776_v24, %v2776_v24 }
 0x5b2   : > { %v1172_v26 = vpop.f32.mrb[14].mxu1 }
 0x5b3   : > { %v2135_v27 = vpop.f32.mrb[15].mxu1 }
 0x5e3   : > { %v1217_v28 = vpop.f32.mrb[24].mxu0 }
 0x5e4   : > { %v2140_v29 = vpop.f32.mrb[25].mxu0  ;;  %v1512_v9 = vpack.c.bf16 %v1217_v28, %v1217_v28 }
 0x5e5   : > { %v1220_v30 = vpop.f32.mrb[26].mxu0 }
 0x5e6   : > { %v2141_v31 = vpop.f32.mrb[27].mxu0 }
 0x609   : > { %v1265_v33 = vpop.f32.mrb[16].mxu1 }
 0x60a   : > { %v1513_v34 = vpack.c.bf16 %v1265_v33, %v1265_v33  ;;  %v2146_v35 = vpop.f32.mrb[17].mxu1 }
 0x60b   : > { %v1268_v36 = vpop.f32.mrb[18].mxu1 }
 0x60c   : > { %1521 = vrot.lane.b32.xlu0 %v1513_v34, %s2397_s18  ;;  %v2147_v37 = vpop.f32.mrb[19].mxu1 }
 0x618   : > { %v1313_v38 = vpop.f32.mrb[28].mxu0 }
 0x619   : > { %v1514_v39 = vpack.c.bf16 %v1313_v38, %v1313_v38  ;;  %v2152_v47 = vpop.f32.mrb[29].mxu0  ;;  %v2268_v38 = vld [vmem:[%s2925_s10] sm:$0xff]  }
 0x61a   : > { %v1316_v32 = vpop.f32.mrb[30].mxu0  ;;  %2187 = vmatpush3.bf16.msra.mxu0 %v2268_v38 }
 0x61b   : > { %1523 = vrot.lane.b32.xlu1 %v1514_v39, %s2397_s18  ;;  %v2153_v41 = vpop.f32.mrb[31].mxu0  ;;  %s2399_s18 = smov 24   ;;  %v2269_v39 = vld [vmem:[%s2925_s10 + $0x8] sm:$0xff]   ;;  %2188 = vmatprep.subr.bf16.mxu0 %v2390_v16 }
 0x61e   : > { %2189 = vmatpush3.bf16.msra.mxu0 %v2269_v39 }
 0x620   : > { %v1409_v42 = vpop.f32.mrb[32].mxu0 }
 0x621   : > { %v1516_v48 = vpack.c.bf16 %v1409_v42, %v1409_v42  ;;  %v2164_v49 = vpop.f32.mrb[33].mxu0 }
 0x622   : > { %v1412_v52 = vpop.f32.mrb[34].mxu0 }
 0x623   : > { %1529 = vrot.lane.b32.xlu1 %v1516_v48, %s2398_s20  ;;  %v2165_v53 = vpop.f32.mrb[35].mxu0 }
 0x63e   : > { %v1361_v55 = vpop.f32.mrb[20].mxu1 }
 0x63f   : > { %v1515_v56 = vpack.c.bf16 %v1361_v55, %v1361_v55  ;;  %v2158_v57 = vpop.f32.mrb[21].mxu1 }
 0x640   : > { %v1364_v58 = vpop.f32.mrb[22].mxu1 }
 0x641   : > { %1527 = vrot.lane.b32.xlu0 %v1515_v56, %s2398_s20  ;;  %v2159_v59 = vpop.f32.mrb[23].mxu1  ;;  %v1998_v58 = vld [vmem:[%s2924_s9] ss:$0 sm:$0xff] }
 0x646   : > { %v1457_v51 = vpop.f32.mrb[24].mxu1 }
 0x647   : > { %v1517_v60 = vpack.c.bf16 %v1457_v51, %v1457_v51  ;;  %v2170_v61 = vpop.f32.mrb[25].mxu1 }
 0x648   : > { %v1460_v62 = vpop.f32.mrb[26].mxu1  ;;  %v2270_v61 = vld [vmem:[%s2927_s12] sm:$0xff]  }
 0x649   : > { %1533 = vrot.lane.b32.xlu0 %v1517_v60, %s2399_s18  ;;  %v2171_v63 = vpop.f32.mrb[27].mxu1  ;;  %v2271_v62 = vld [vmem:[%s2927_s12 + $0x8] sm:$0xff]  }
 0x64a   : > { %v2272_v63 = vld [vmem:[%s2927_s12 + $0x10] sm:$0xff]  }
 0x64c   : > { %v1505_v0 = vpop.f32.mrb[36].mxu0 }
 0x64d   : > { %v1518_v3 = vpack.c.bf16 %v1505_v0, %v1505_v0  ;;  %v2176_v4 = vpop.f32.mrb[37].mxu0  ;;  %v2273_v0 = vld [vmem:[%s2927_s12 + $0x18] sm:$0xff]  }
 0x64e   : > { %v1508_v5 = vpop.f32.mrb[38].mxu0  ;;  %v2275_v4 = vld [vmem:[%s2927_s12 + $0x28] sm:$0xff]  }
 0x64f   : > { %1535 = vrot.lane.b32.xlu1 %v1518_v3, %s2399_s18  ;;  %v2177_v43 = vpop.f32.mrb[39].mxu0  ;;  %v2274_v3 = vld [vmem:[%s2927_s12 + $0x20] sm:$0xff]   ;;  %v2276_v5 = vld [vmem:[%s2927_s12 + $0x30] sm:$0xff]   ;;  %s1889_s18 = sshll.u32 %s475_s28, 4  ;;  %s2870_s18 = int_to_ptr.vmem [resolvable:$true] %s1889_s18 }
 0x650   : > { %v2277_v43 = vld [vmem:[%s2927_s12 + $0x38] sm:$0xff]   ;;  %s2326_s21 = scalar_lea.vmem %s2870_s18, 128  ;;  %p2333_p0 = scmp.lt.s32.totalorder %s2870_s18, %s2331_s2 }
 0x651   : > { %p2327_p11 = scmp.ne.s32.totalorder %s2870_s18, %s2326_s21  ;;  %p2334_p1 = scmp.lt.s32.totalorder %s2332_s1, %s2326_s21 }
 0x653   : > { %p2328_p12 = pnand %p2327_p11, %p2515_p5  ;;  %p2335_p2 = por %p2334_p1, %p2333_p0 }
 0x655   : > { %p2329_p13 = pneg %p2328_p12 }
 0x657   : > { %p2336_p3 = pnand %p2335_p2, %p2329_p13 }
 0x67e   : > { %v1522_v44 = vpop.permute.xlu0 %1521 }
 0x67f   : > { %v1539_v11 = vsel %vm625_vm2, %v1511_v8, %v1522_v44  ;;  %v1999_v44 = vld [vmem:[%s2926_s11] ss:$0 sm:$0xff] }
 0x68d   : > { %v1524_v40 = vpop.permute.xlu1 %1523 }
 0x68e   : > { %v1542_v45 = vsel %vm625_vm2, %v1512_v9, %v1524_v40 }
 0x695   : > { %v1530_v7 = vpop.permute.xlu1 %1529 }
 0x696   : > { %v1547_v12 = vsel %vm1543_vm4, %v1542_v45, %v1530_v7 }
 0x6b3   : > { %v1528_v6 = vpop.permute.xlu0 %1527 }
 0x6b4   : > { %v1545_v13 = vsel %vm1543_vm4, %v1539_v11, %v1528_v6 }
 0x6bb   : > { %v1534_v10 = vpop.permute.xlu0 %1533 }
 0x6bc   : > { %v1550_v15 = vsel %vm1548_vm5, %v1545_v13, %v1534_v10 }
 0x6c1   : > { %v1536_v14 = vpop.permute.xlu1 %1535 }
 0x6c2   : > { %v1552_v17 = vsel %vm1548_vm5, %v1547_v12, %v1536_v14 }
 0x6c3   : > { %v1993_v18 = vcombine.low %v1550_v15, %v1552_v17 }
 0x6c5   : > { %2183 = vmatmul.mubr.msk.bf16.vlgmr.msra.gmra.mrb[28].mxu1 %vm493_vm0, %v1993_v18 }
 0x6c6   : > { %2210 = vmatprep.mubr.msk.bf16.mxu1 %vm2391_vm1, %v2390_v16  ;;  %2195 = vmatpush3.bf16.msra.mxu1 %v2270_v61 }
 0x6c7   : > { %2196 = vmatprep.subr.bf16.mxu1 %v2390_v16 }
 0x6ca   : > { %2197 = vmatpush3.bf16.msra.mxu1 %v2271_v62 }
 0x6cb   : > { %2198 = vmatprep.subr.bf16.mxu1 %v2390_v16 }
 0x6ce   : > { %2199 = vmatpush3.bf16.msra.mxu1 %v2272_v63 }
 0x6cf   : > { %2200 = vmatprep.subr.bf16.mxu1 %v2390_v16 }
 0x6d2   : > { %2201 = vmatpush3.bf16.msra.mxu1 %v2273_v0 }
 0x6d3   : > { %2202 = vmatprep.subr.bf16.mxu1 %v2390_v16 }
 0x6d6   : > { %2203 = vmatpush3.bf16.msra.mxu1 %v2274_v3 }
 0x6d7   : > { %2204 = vmatprep.subr.bf16.mxu1 %v2390_v16 }
 0x6da   : > { %2205 = vmatpush3.bf16.msra.mxu1 %v2275_v4 }
 0x6db   : > { %2206 = vmatprep.subr.bf16.mxu1 %v2390_v16 }
 0x6de   : > { %2207 = vmatpush3.bf16.msra.mxu1 %v2276_v5 }
 0x6df   : > { %2208 = vmatprep.subr.bf16.mxu1 %v2390_v16 }
 0x6e2   : > { %2209 = vmatpush3.bf16.msra.mxu1 %v2277_v43 }
 0x798   : > { %v1618_v50 = vpop.f32.mrb[28].mxu1 }
 0x799   : > { %v1619_v20 = vadd.f32 %v1992_v19, %v1618_v50  ;;  %v2184_v21 = vpop.f32.mrb[29].mxu1 }
 0x79a   : > { %v1621_v22 = vpop.f32.mrb[30].mxu1 }
 0x79b   : > { %v2797_v23 = vadd.f32 %v2532_v1, %v1619_v20  ;;  %v1622_v24 = vadd.f32 %v1992_v19, %v1621_v22  ;;  %v2185_v25 = vpop.f32.mrb[31].mxu1  ;;  %v2005_v22 = vld [vmem:[%s2928_s13] ss:$0 sm:$0xff] }
 0x79d   : > { %v2800_v26 = vadd.f32 %v2534_v2, %v1622_v24  ;;  %v1627_v27 = vsel %vm493_vm0, %v2797_v23, 0.0 }
 0x79e   : > { %1628 = vadd.xlane.f32.xlu0 %v1627_v27 }
 0x79f   : > { %v1630_v28 = vsel %vm493_vm0, %v2800_v26, 0.0 }
 0x7a0   : > { %1631 = vadd.xlane.f32.xlu1 %v1630_v28 }
 0x82b   : > { %v1629_v29 = vpop.xlane.xlu0 %1628 }
 0x82c   : > { %v1633_v30 = vmul.f32 0.03125, %v1629_v29 }
 0x82d   : > { %v1632_v31 = vpop.xlane.xlu1 %1631 }
 0x82e   : > { %v1635_v33 = vsub.f32 %v2797_v23, %v1633_v30  ;;  %v1634_v1 = vmul.f32 0.03125, %v1632_v31 }
 0x830   : > { %v1636_v34 = vsub.f32 %v2800_v26, %v1634_v1  ;;  %v1637_v35 = vmul.f32 %v1635_v33, %v1635_v33 }
 0x832   : > { %v1639_v2 = vsel %vm493_vm0, %v1637_v35, 0.0  ;;  %v1638_v36 = vmul.f32 %v1636_v34, %v1636_v34 }
 0x833   : > { %1640 = vadd.xlane.f32.xlu0 %v1639_v2 }
 0x834   : > { %v1642_v37 = vsel %vm493_vm0, %v1638_v36, 0.0 }
 0x837   : > { %1643 = vadd.xlane.f32.xlu0 %v1642_v37 }
 0x8c0   : > { %v1641_v47 = vpop.xlane.xlu0 %1640 }
 0x8c1   : > { %v1645_v32 = vmul.f32 0.03125, %v1641_v47 }
 0x8c3   : > { %v1647_v41 = vadd.f32 1e-05, %v1645_v32 }
 0x8c4   : > { %v1644_v42 = vpop.xlane.xlu0 %1643 }
 0x8c5   : > { %2314 = vrsqrt.f32 %v1647_v41  ;;  %v1646_v48 = vmul.f32 0.03125, %v1644_v42 }
 0x8c7   : > { %v1648_v49 = vadd.f32 1e-05, %v1646_v48 }
 0x8c9   : > { %2316 = vrsqrt.f32 %v1648_v49 }
 0x8cf   : > { %v2315_v52 = vpop.eup %2314 }
 0x8d0   : > { %v1651_v53 = vmul.f32 %v2315_v52, %v1635_v33 }
 0x8d2   : > { %v1660_v56 = vmul.f32 %v1997_v54, %v1651_v53 }
 0x8d3   : > { %v2317_v55 = vpop.eup %2316 }
 0x8d4   : > { %v1652_v57 = vmul.f32 %v2317_v55, %v1636_v34  ;;  %v1669_v46 = vadd.f32 %v1998_v58, %v1660_v56 }
 0x8d6   : > { %v1661_v59 = vmul.f32 %v1997_v54, %v1652_v57 }
 0x8d8   : > { %v1670_v51 = vadd.f32 %v1998_v58, %v1661_v59 }
 0x8da   : > { %v1671_v60 = vpack.c.bf16 %v1670_v51, %v1669_v46 }
 0x8dc   : > { %2191 = vmatmul.mubr.msk.bf16.vlgmr.msra.gmra.mrb[40].mxu0 %vm493_vm0, %v1671_v60 }
 0x9af   : > { %v1732_v40 = vpop.f32.mrb[40].mxu0 }
 0x9b0   : > { %v1733_v6 = vadd.f32 %v1999_v44, %v1732_v40  ;;  %v2192_v7 = vpop.f32.mrb[41].mxu0 }
 0x9b1   : > { %v1735_v8 = vpop.f32.mrb[42].mxu0 }
 0x9b2   : > { %v2003_v9 = vmul.f32 -1.702, %v1733_v6  ;;  %v1736_v10 = vadd.f32 %v1999_v44, %v1735_v8  ;;  %v2193_v11 = vpop.f32.mrb[43].mxu0 }
 0x9b4   : > { %v1743_v45 = vmul.f32 1.442695, %v2003_v9  ;;  %v2004_v12 = vmul.f32 -1.702, %v1736_v10 }
 0x9b6   : > { %2318 = vpow2.f32 %v1743_v45  ;;  %v1745_v16 = vmul.f32 1.442695, %v2004_v12 }
 0x9b8   : > { %2320 = vpow2.f32 %v1745_v16 }
 0x9c0   : > { %v2319_v13 = vpop.eup %2318 }
 0x9c1   : > { %v1747_v14 = vadd.f32 1.0, %v2319_v13 }
 0x9c2   : > { %v2321_v15 = vpop.eup %2320 }
 0x9c3   : > { %2322 = vrcp.f32 %v1747_v14  ;;  %v1748_v17 = vadd.f32 1.0, %v2321_v15 }
 0x9c5   : > { %2324 = vrcp.f32 %v1748_v17 }
 0x9cd   : > { %v2323_v18 = vpop.eup %2322 }
 0x9ce   : > { %v1753_v50 = vmul.f32 %v2323_v18, %v1733_v6 }
 0x9cf   : > { %v2325_v19 = vpop.eup %2324 }
 0x9d0   : > { %v1754_v20 = vmul.f32 %v2325_v19, %v1736_v10 }
 0x9d2   : > { %v1755_v21 = vpack.c.bf16 %v1754_v20, %v1753_v50 }
 0x9d4   : > { %2211 = vmatmul.mubr.bf16.vlgmr.msra.gmra.mrb[32].mxu1 %v1755_v21 }
 0xaa7   : > { %v1861_v24 = vpop.f32.mrb[32].mxu1 }
 0xaa8   : > { %v1862_v25 = vadd.f32 %v2005_v22, %v1861_v24  ;;  %v2212_v27 = vpop.f32.mrb[33].mxu1 }
 0xaa9   : > { %v1864_v28 = vpop.f32.mrb[34].mxu1 }
 0xaaa   : > { %v1868_v29 = vadd.f32 %v1862_v25, %v2797_v23  ;;  %v1865_v30 = vadd.f32 %v2005_v22, %v1864_v28  ;;  %v2213_v31 = vpop.f32.mrb[35].mxu1 }
 0xaac   : > { %v1870_v33 = vpack.c.bf16 %v1868_v29, %v1868_v29  ;;  %v1869_v1 = vadd.f32 %v1865_v30, %v2800_v26 }
 0xaae   : > { %1873 = vst.msk [vmem:[%s475_s28] sm:$0xf] %vm1872_vm6, %v1870_v33  ;;  %v1871_v34 = vpack.c.bf16 %v1869_v1, %v1869_v1 }
 0xab0   : > { %1874 = vst.msk [vmem:[%s475_s28 + $0x4] sm:$0xf] %vm1872_vm6, %v1871_v34 }
 0xab1   : > { %2339 = shalt.err (!%p2336_p3)
}
 0xab2   : > { %s2340_s0 = scalar_lea.hbm %s2868_s26, 128  ;;  %s2344_s20 = scalar_lea.hbm %s2929_s14, 256 }
 0xab3   : > { %p2341_p4 = scmp.ne.s32.totalorder %s2868_s26, %s2340_s0  ;;  %p2345_p9 = scmp.lt.u32.totalorder %s2868_s26, %s2929_s14 }
 0xab4   : > { %p2346_p10 = scmp.lt.u32.totalorder %s2344_s20, %s2340_s0  ;;  %p2348_p12 = scmp.lt.u32.totalorder %s2340_s0, %s2868_s26 }
 0xab5   : > { %p2342_p7 = pnand %p2341_p4, %p2515_p5 }
 0xab6   : > { %p2347_p11 = por %p2346_p10, %p2345_p9 }
 0xab7   : > { %p2343_p8 = pneg %p2342_p7 }
 0xab8   : > { %p2349_p13 = por %p2348_p12, %p2347_p11 }
 0xaba   : > { %p2350_p0 = pnand %p2349_p13, %p2343_p8 }
 0xabc   : > { %2353 = shalt.err (!%p2350_p0)
}
 0xabd   : > { %s2401_s21 = smov 4   ;;  %s2939_s1 = smov 64  }
 0xabe   : > { %2214 = dma.vmem_to_hbm [thread:$0]  (%p2515_p5), %s2870_s18, 128, %s2868_s26, %s2872_s17, %s2939_s1, %s2939_s1, %s2401_s21  }
 0xabf PF: > { %p2220_p1 = scmp.ge.s32.totalorder %s2388_s16, 2  ;;  %s1904_s25 = sand.u32 1, %s2376_s29  }
 0xac0   : > { %s1905_s0 = scalar_lea.sflag [#allocation3], %s1904_s25 }
 0xac1   : > { %p2217_p2 = pnand %p2220_p1, %p2519_p6 }
 0xac3   : > { %2371 = dma.done.wait (!%p2217_p2), %s1905_s0, 128  }
 0xac4   : > { %2373 = vsyncadd (!%p2217_p2), %s1905_s0, 4294967168  ;;  %p24_p3 = scmp.ge.s32.totalorder %s2502_s19, 4   ;;  %s2940_s29 = smov %s2380_s30 }
 0xac5   : > { %s2941_s30 = smov %s2384_s15  ;;  %s2942_s15 = smov %s2513_s22 }
 0xac6   : > { %s2943_s16 = smov %s2502_s19  ;;  %26 = sbr.rel (!%p24_p3) target bundleno = 7 (0x7), region = 114 }
 0xacd   :  { %1910 = vsyncpa [#allocation3], 1 }
 0xace   :  { %1912 = vsyncpa [#allocation3 + $0x1], 1 }

// kernel: _forward_layers.2
= control target key start
LH: loop header
LB: loop body
LE: loop exit
PB: predicated region body
PF: predicated region fallthrough
CT: control target
= control target key end

     0   :  { %s2367_s29 = smov 0   ;;  %s2722_s0 = inlined_call_operand.vmem [shape: bf16[4,8,32], index: 0, kind: input, shape index: {}]   ;;  %s2723_s1 = inlined_call_operand.vmem [shape: f32[4,1,8], index: 1, kind: input, shape index: {}]   ;;  %s2724_s2 = inlined_call_operand.vmem [shape: f32[1,32], index: 2, kind: input, shape index: {}]   ;;  %s2725_s3 = inlined_call_operand.vmem [shape: f32[1,32], index: 3, kind: input, shape index: {}]   ;;  %s2726_s4 = inlined_call_operand.vmem [shape: bf16[32,96], index: 4, kind: input, shape index: {}]   ;;  %s2727_s5 = inlined_call_operand.vmem [shape: f32[1,96], index: 5, kind: input, shape index: {}]   ;;  %s2728_s6 = inlined_call_operand.vmem [shape: bf16[32,32], index: 6, kind: input, shape index: {}]   ;;  %s2729_s7 = inlined_call_operand.vmem [shape: f32[1,32], index: 7, kind: input, shape index: {}]   ;;  %s2730_s8 = inlined_call_operand.vmem [shape: f32[1,32], index: 8, kind: input, shape index: {}]   ;;  %s2731_s9 = inlined_call_operand.vmem [shape: f32[1,32], index: 9, kind: input, shape index: {}]   ;;  %s2732_s10 = inlined_call_operand.vmem [shape: bf16[32,128], index: 10, kind: input, shape index: {}]   ;;  %s2733_s11 = inlined_call_operand.vmem [shape: f32[1,128], index: 11, kind: input, shape index: {}]   ;;  %s2734_s12 = inlined_call_operand.vmem [shape: bf16[128,32], index: 12, kind: input, shape index: {}]   ;;  %s2735_s13 = inlined_call_operand.vmem [shape: f32[1,32], index: 13, kind: input, shape index: {}]   ;;  %s2736_s14 = inlined_call_operand.vmem [shape: bf16[4,8,32], index: 14, kind: output, shape index: {}]  }
   0x1 LB: > { %s1942_s30 = sadd.s32 4294967295, %s2280_s29   ;;  %p1946_p0 = scmp.ge.s32.totalorder %s2280_s29, 1  ;;  %s2280_s29 = sphi %s2367_s29, %s24_s29  }
   0x2   : > { %p423_p1 = scmp.lt.s32.totalorder %s2280_s29, 3 }
   0x4   : > { %p424_p2 = pnand %p1946_p0, %p423_p1 }
   0x5   : > { %s1947_s15 = sshll.u32 (!%p424_p2), %s1942_s30, 1  ;;  %vm495_vm0 = vcmask (!%p424_p2), 261120   ;;  %v2212_v15 = vld [vmem:[%s2726_s4] sm:$0xff] (!%p424_p2)   ;;  %v2282_v16 = vmov (!%p424_p2), 0.0   ;;  %v2213_v17 = vld [vmem:[%s2726_s4 + $0x8] sm:$0xff] (!%p424_p2)   ;;  %vm2283_vm1 = vmmov (!%p424_p2), 0  }
   0x6   : > { %427 = sbr.rel (%p424_p2) target bundleno = 2725 (0xaa5), region = 76  ;;  %p474_p3 = scmp.lt.s32.totalorder (!%p424_p2), %s1947_s15, 3  ;;  %2054 = vmatprep.subr.bf16.mxu0 (!%p424_p2), %v2282_v16  ;;  %2074 = vmatprep.subr.bf16.mxu1 (!%p424_p2), %v2282_v16  ;;  %v1952_v26 = vld [vmem:[%s2724_s2] ss:$0 sm:$0xff] (!%p424_p2)  ;;  %vm627_vm2 = vcmask (!%p424_p2), 64512   ;;  %vm1133_vm3 = vcmask (!%p424_p2), 1043456  }
   0x7   : > { %2055 = vmatpush3.bf16.msra.mxu0 (!%p424_p2), %v2212_v15  ;;  %2058 = vmatprep.mubr.msk.bf16.mxu0 (!%p424_p2), %vm2283_vm1, %v2282_v16  ;;  %v1953_v30 = vld [vmem:[%s2725_s3] ss:$0 sm:$0xff] (!%p424_p2)  ;;  %s2284_s17 = smov (!%p424_p2), 120   ;;  %s2285_s18 = smov (!%p424_p2), 104   ;;  %vm1545_vm4 = vcmask (!%p424_p2), 130048   ;;  %vm1550_vm5 = vcmask (!%p424_p2), 195584  }
   0x8   : > { %2056 = vmatprep.subr.bf16.mxu0 (!%p424_p2), %v2282_v16  ;;  %2076 = vmatprep.mubr.msk.bf16.mxu1 (!%p424_p2), %vm2283_vm1, %v2282_v16  ;;  %v1954_v35 = vld [vmem:[%s2727_s5] ss:$0 sm:$0xff] (!%p424_p2)  ;;  %s2287_s20 = smov (!%p424_p2), 96   ;;  %s2288_s24 = smov (!%p424_p2), 64   ;;  %vm1874_vm6 = vcmask (!%p424_p2), 257024  }
   0x9   : > { %s2289_s25 = smov (!%p424_p2), 8   ;;  %s2290_s26 = smov (!%p424_p2), 16  }
   0xb   : > { %2057 = vmatpush3.bf16.msra.mxu0 (!%p424_p2), %v2213_v17 }
   0xc   : > { %2062 = vmatprep.subr.bf16.mxu0 (!%p424_p2), %v2282_v16 }
   0xd   : > { %s2738_s15 = smov (!%p474_p3, %s1947_s15), 3 }
   0xe   : > { %s1948_s16 = sshll.u32 %s2738_s15, 2  ;;  %s482_s23 = scalar_lea.vmem %s2723_s1, %s2738_s15 }
   0xf   : > { %s477_s19 = scalar_lea.vmem %s2722_s0, %s1948_s16 }
  0x10   : > { %v2001_v0 = vld [vmem:[%s477_s19] sm:$0xff]   ;;  %s2286_s19 = smov 112  }
  0x11   : > { %v2383_v1 = vunpack.c.l.bf16 %v2001_v0  ;;  %v2385_v2 = vunpack.c.h.bf16 %v2001_v0 }
  0x13   : > { %v496_v3 = vsel %vm495_vm0, %v2383_v1, 0.0  ;;  %v499_v4 = vsel %vm495_vm0, %v2385_v2, 0.0 }
  0x14   : > { %497 = vadd.xlane.f32.xlu0 %v496_v3 }
  0x18   : > { %500 = vadd.xlane.f32.xlu0 %v499_v4  ;;  %v1966_v4 = vld [vmem:[%s482_s23] ss:$0 sm:$0xff] }
  0xa1   : > { %v498_v5 = vpop.xlane.xlu0 %497 }
  0xa2   : > { %v503_v6 = vmul.f32 0.03125, %v498_v5 }
  0xa4   : > { %v505_v7 = vsub.f32 %v2383_v1, %v503_v6 }
  0xa5   : > { %v501_v8 = vpop.xlane.xlu0 %500 }
  0xa6   : > { %v504_v9 = vmul.f32 0.03125, %v501_v8  ;;  %v507_v10 = vmul.f32 %v505_v7, %v505_v7 }
  0xa8   : > { %v506_v11 = vsub.f32 %v2385_v2, %v504_v9  ;;  %v509_v12 = vsel %vm495_vm0, %v507_v10, 0.0 }
  0xa9   : > { %510 = vadd.xlane.f32.xlu1 %v509_v12 }
  0xaa   : > { %v508_v13 = vmul.f32 %v506_v11, %v506_v11 }
  0xac   : > { %v512_v14 = vsel %vm495_vm0, %v508_v13, 0.0 }
  0xad   : > { %513 = vadd.xlane.f32.xlu1 %v512_v14 }
 0x136   : > { %v511_v18 = vpop.xlane.xlu1 %510 }
 0x137   : > { %v515_v19 = vmul.f32 0.03125, %v511_v18 }
 0x139   : > { %v517_v20 = vadd.f32 1e-05, %v515_v19 }
 0x13a   : > { %v514_v21 = vpop.xlane.xlu1 %513 }
 0x13b   : > { %2226 = vrsqrt.f32 %v517_v20  ;;  %v516_v22 = vmul.f32 0.03125, %v514_v21 }
 0x13d   : > { %v518_v23 = vadd.f32 1e-05, %v516_v22 }
 0x13f   : > { %2228 = vrsqrt.f32 %v518_v23 }
 0x145   : > { %v2227_v24 = vpop.eup %2226 }
 0x146   : > { %v521_v25 = vmul.f32 %v2227_v24, %v505_v7 }
 0x148   : > { %v530_v29 = vmul.f32 %v1952_v26, %v521_v25 }
 0x149   : > { %v2229_v27 = vpop.eup %2228 }
 0x14a   : > { %v522_v28 = vmul.f32 %v2229_v27, %v506_v11  ;;  %v539_v32 = vadd.f32 %v1953_v30, %v530_v29  ;;  %v1967_v11 = vld [vmem:[%s482_s23 + $0x1] ss:$0 sm:$0xff] }
 0x14c   : > { %v531_v31 = vmul.f32 %v1952_v26, %v522_v28 }
 0x14e   : > { %v540_v33 = vadd.f32 %v1953_v30, %v531_v31 }
 0x150   : > { %v541_v34 = vpack.c.bf16 %v540_v33, %v539_v32 }
 0x152   : > { %2059 = vmatmul.mubr.msk.bf16.vlgmr.msra.gmra.mrb[0].mxu0 %vm495_vm0, %v541_v34 }
 0x153   : > { %2064 = vmatprep.mubr.msk.bf16.mxu0 %vm2283_vm1, %v2282_v16 }
 0x225   : > { %v602_v36 = vpop.f32.mrb[0].mxu0 }
 0x226   : > { %v603_v37 = vadd.f32 %v1954_v35, %v602_v36  ;;  %v2060_v38 = vpop.f32.mrb[1].mxu0 }
 0x227   : > { %v605_v39 = vpop.f32.mrb[2].mxu0 }
 0x228   : > { %v2421_v40 = vpack.c.bf16 %v603_v37, %v603_v37  ;;  %v606_v41 = vadd.f32 %v1954_v35, %v605_v39  ;;  %v2061_v42 = vpop.f32.mrb[3].mxu0 }
 0x22a   : > { %v2423_v43 = vpack.c.bf16 %v606_v41, %v606_v41  ;;  %613 = vrot.lane.b32.xlu0 %v2421_v40, %s2284_s17 }
 0x22c   : > { %615 = vrot.lane.b32.xlu1 %v2423_v43, %s2284_s17 }
 0x22e   : > { %621 = vrot.lane.b32.xlu0 %v2421_v40, %s2285_s18 }
 0x230   : > { %617 = vrot.lane.b32.xlu1 %v2421_v40, %s2286_s19 }
 0x232   : > { %625 = vrot.lane.b32.xlu0 %v2421_v40, %s2287_s20 }
 0x234   : > { %619 = vrot.lane.b32.xlu1 %v2423_v43, %s2286_s19 }
 0x238   : > { %623 = vrot.lane.b32.xlu1 %v2423_v43, %s2285_s18  ;;  %s2291_s18 = smov 24  }
 0x23c   : > { %674 = vrot.lane.b32.xlu1 %v2423_v43, %s2287_s20 }
 0x29c   : > { %v2433_v44 = vpop.permute.xlu0 %613 }
 0x29d   : > { %722 = vrot.lane.b32.xlu0 %v2433_v44, %s2287_s20 }
 0x29e   : > { %v2436_v45 = vpop.permute.xlu1 %615 }
 0x29f   : > { %770 = vrot.lane.b32.xlu1 %v2436_v45, %s2287_s20 }
 0x2a0   : > { %v2439_v46 = vpop.permute.xlu0 %621 }
 0x2a2   : > { %v2441_v47 = vpop.permute.xlu1 %617 }
 0x2a3   : > { %818 = vrot.lane.b32.xlu0 %v2441_v47, %s2287_s20 }
 0x2a4   : > { %v626_v48 = vpop.permute.xlu0 %625 }
 0x2a5   : > { %v632_v49 = vsel %vm627_vm2, %v626_v48, 0 }
 0x2a6   : > { %2063 = vmatpush3.bf16.xpose.msra.mxu0 %v632_v49  ;;  %v2445_v50 = vpop.permute.xlu1 %619 }
 0x2a7   : > { %914 = vrot.lane.b32.xlu0 %v2439_v46, %s2287_s20  ;;  %866 = vrot.lane.b32.xlu1 %v2445_v50, %s2287_s20 }
 0x2a8   : > { %2068 = vmatprep.subr.bf16.mxu0 %v2282_v16 }
 0x2aa   : > { %v2450_v51 = vpop.permute.xlu1 %623 }
 0x2ab   : > { %962 = vrot.lane.b32.xlu1 %v2450_v51, %s2287_s20 }
 0x2ad   : > { %2065 = vmatmul.mubr.msk.bf16.vlgmr.msra.gmra.mrb[4].mxu0 %vm627_vm2, %v2421_v40 }
 0x2ae   : > { %v675_v52 = vpop.permute.xlu1 %674  ;;  %2070 = vmatprep.mubr.msk.bf16.mxu0 %vm2283_vm1, %v2282_v16 }
 0x2af   : > { %v680_v53 = vsel %vm627_vm2, %v675_v52, 0 }
 0x2b0   : > { %2069 = vmatpush3.bf16.xpose.msra.mxu0 %v680_v53 }
 0x2b1   : > { %2080 = vmatprep.subr.bf16.mxu0 %v2282_v16 }
 0x2b7   : > { %2071 = vmatmul.mubr.msk.bf16.vlgmr.msra.gmra.mrb[8].mxu0 %vm627_vm2, %v2423_v43 }
 0x2b8   : > { %2082 = vmatprep.mubr.msk.bf16.mxu0 %vm2283_vm1, %v2282_v16 }
 0x30f   : > { %v723_v54 = vpop.permute.xlu0 %722 }
 0x310   : > { %v728_v55 = vsel %vm627_vm2, %v723_v54, 0 }
 0x311   : > { %2075 = vmatpush3.bf16.xpose.msra.mxu1 %v728_v55  ;;  %v771_v56 = vpop.permute.xlu1 %770 }
 0x312   : > { %v776_v57 = vsel %vm627_vm2, %v771_v56, 0  ;;  %2086 = vmatprep.subr.bf16.mxu1 %v2282_v16 }
 0x313   : > { %2081 = vmatpush3.bf16.xpose.msra.mxu0 %v776_v57 }
 0x314   : > { %2092 = vmatprep.subr.bf16.mxu0 %v2282_v16 }
 0x315   : > { %v819_v58 = vpop.permute.xlu0 %818 }
 0x316   : > { %v824_v59 = vsel %vm627_vm2, %v819_v58, 0 }
 0x318   : > { %2077 = vmatmul.mubr.msk.bf16.vlgmr.msra.gmra.mrb[0].mxu1 %vm627_vm2, %v2433_v44 }
 0x319   : > { %2087 = vmatpush3.bf16.xpose.msra.mxu1 %v824_v59  ;;  %v867_v60 = vpop.permute.xlu1 %866  ;;  %2088 = vmatprep.mubr.msk.bf16.mxu1 %vm2283_vm1, %v2282_v16  ;;  %v915_v62 = vpop.permute.xlu0 %914 }
 0x31a   : > { %v872_v61 = vsel %vm627_vm2, %v867_v60, 0  ;;  %2083 = vmatmul.mubr.msk.bf16.vlgmr.msra.gmra.mrb[12].mxu0 %vm627_vm2, %v2436_v45  ;;  %2098 = vmatprep.subr.bf16.mxu1 %v2282_v16  ;;  %v920_v0 = vsel %vm627_vm2, %v915_v62, 0 }
 0x31b   : > { %2093 = vmatpush3.bf16.xpose.msra.mxu0 %v872_v61  ;;  %2094 = vmatprep.mubr.msk.bf16.mxu0 %vm2283_vm1, %v2282_v16 }
 0x31c   : > { %2104 = vmatprep.subr.bf16.mxu0 %v2282_v16 }
 0x31d   : > { %v963_v63 = vpop.permute.xlu1 %962 }
 0x31e   : > { %v968_v3 = vsel %vm627_vm2, %v963_v63, 0 }
 0x320   : > { %2089 = vmatmul.mubr.msk.bf16.vlgmr.msra.gmra.mrb[4].mxu1 %vm627_vm2, %v2441_v47 }
 0x321   : > { %2099 = vmatpush3.bf16.xpose.msra.mxu1 %v920_v0  ;;  %2100 = vmatprep.mubr.msk.bf16.mxu1 %vm2283_vm1, %v2282_v16 }
 0x322   : > { %2095 = vmatmul.mubr.msk.bf16.vlgmr.msra.gmra.mrb[16].mxu0 %vm627_vm2, %v2445_v50  ;;  %2110 = vmatprep.subr.bf16.mxu1 %v2282_v16 }
 0x323   : > { %2105 = vmatpush3.bf16.xpose.msra.mxu0 %v968_v3  ;;  %2106 = vmatprep.mubr.msk.bf16.mxu0 %vm2283_vm1, %v2282_v16 }
 0x324   : > { %2116 = vmatprep.subr.bf16.mxu0 %v2282_v16 }
 0x328   : > { %2101 = vmatmul.mubr.msk.bf16.vlgmr.msra.gmra.mrb[8].mxu1 %vm627_vm2, %v2439_v46 }
 0x329   : > { %2112 = vmatprep.mubr.msk.bf16.mxu1 %vm2283_vm1, %v2282_v16 }
 0x32a   : > { %2107 = vmatmul.mubr.msk.bf16.vlgmr.msra.gmra.mrb[20].mxu0 %vm627_vm2, %v2450_v51 }
 0x32b   : > { %2118 = vmatprep.mubr.msk.bf16.mxu0 %vm2283_vm1, %v2282_v16 }
 0x380   : > { %v668_v5 = vpop.f32.mrb[4].mxu0 }
 0x381   : > { %v1024_v6 = vadd.f32 %v1966_v4, %v668_v5  ;;  %v2066_v7 = vpop.f32.mrb[5].mxu0 }
 0x382   : > { %v671_v8 = vpop.f32.mrb[6].mxu0 }
 0x383   : > { %v2067_v9 = vpop.f32.mrb[7].mxu0  ;;  %v1032_v10 = vsel %vm627_vm2, %v1024_v6, -inf }
 0x384   : > { %1033 = vmax.xlane.f32.xlu0 %v1032_v10 }
 0x38a   : > { %v716_v12 = vpop.f32.mrb[8].mxu0 }
 0x38b   : > { %v1025_v13 = vadd.f32 %v1967_v11, %v716_v12  ;;  %v2072_v14 = vpop.f32.mrb[9].mxu0 }
 0x38c   : > { %v719_v15 = vpop.f32.mrb[10].mxu0 }
 0x38d   : > { %v2073_v17 = vpop.f32.mrb[11].mxu0  ;;  %v1035_v18 = vsel %vm627_vm2, %v1025_v13, -inf }
 0x38e   : > { %1036 = vmax.xlane.f32.xlu1 %v1035_v18 }
 0x3eb   : > { %v764_v19 = vpop.f32.mrb[0].mxu1 }
 0x3ec   : > { %v2505_v20 = vadd.f32 %v1966_v4, %v764_v19  ;;  %v2078_v21 = vpop.f32.mrb[1].mxu1 }
 0x3ed   : > { %v767_v22 = vpop.f32.mrb[2].mxu1  ;;  %v812_v23 = vpop.f32.mrb[12].mxu0 }
 0x3ee   : > { %v2507_v24 = vadd.f32 %v1967_v11, %v812_v23  ;;  %v2079_v25 = vpop.f32.mrb[3].mxu1  ;;  %v2084_v26 = vpop.f32.mrb[13].mxu0  ;;  %v1038_v27 = vsel %vm627_vm2, %v2505_v20, -inf }
 0x3ef   : > { %1039 = vmax.xlane.f32.xlu0 %v1038_v27  ;;  %v815_v28 = vpop.f32.mrb[14].mxu0 }
 0x3f0   : > { %v2085_v29 = vpop.f32.mrb[15].mxu0  ;;  %v1041_v30 = vsel %vm627_vm2, %v2507_v24, -inf }
 0x3f3   : > { %v860_v31 = vpop.f32.mrb[4].mxu1  ;;  %1042 = vmax.xlane.f32.xlu0 %v1041_v30 }
 0x3f4   : > { %v2513_v32 = vadd.f32 %v1966_v4, %v860_v31  ;;  %v2090_v33 = vpop.f32.mrb[5].mxu1 }
 0x3f5   : > { %v863_v34 = vpop.f32.mrb[6].mxu1  ;;  %v908_v35 = vpop.f32.mrb[16].mxu0 }
 0x3f6   : > { %v2515_v36 = vadd.f32 %v1967_v11, %v908_v35  ;;  %v2091_v37 = vpop.f32.mrb[7].mxu1  ;;  %v2096_v38 = vpop.f32.mrb[17].mxu0  ;;  %v1044_v39 = vsel %vm627_vm2, %v2513_v32, -inf }
 0x3f7   : > { %1045 = vmax.xlane.f32.xlu0 %v1044_v39  ;;  %v911_v41 = vpop.f32.mrb[18].mxu0 }
 0x3f8   : > { %v2097_v42 = vpop.f32.mrb[19].mxu0  ;;  %v1047_v48 = vsel %vm627_vm2, %v2515_v36, -inf }
 0x3f9   : > { %1048 = vmax.xlane.f32.xlu1 %v1047_v48 }
 0x3fb   : > { %v956_v49 = vpop.f32.mrb[8].mxu1 }
 0x3fc   : > { %v2521_v52 = vadd.f32 %v1966_v4, %v956_v49  ;;  %v2102_v53 = vpop.f32.mrb[9].mxu1 }
 0x3fd   : > { %v959_v54 = vpop.f32.mrb[10].mxu1  ;;  %v1004_v55 = vpop.f32.mrb[20].mxu0 }
 0x3fe   : > { %v2103_v56 = vpop.f32.mrb[11].mxu1  ;;  %v2108_v57 = vpop.f32.mrb[21].mxu0  ;;  %v1050_v58 = vsel %vm627_vm2, %v2521_v52, -inf  ;;  %v1031_v0 = vadd.f32 %v1967_v11, %v1004_v55 }
 0x3ff   : > { %1051 = vmax.xlane.f32.xlu0 %v1050_v58  ;;  %v1007_v59 = vpop.f32.mrb[22].mxu0 }
 0x400   : > { %v2109_v60 = vpop.f32.mrb[23].mxu0  ;;  %v1053_v4 = vsel %vm627_vm2, %v1031_v0, -inf }
 0x40a   : > { %1177 = vrot.lane.b32.xlu1 %v2423_v43, %s2288_s24 }
 0x40e   : > { %1225 = vrot.lane.b32.xlu1 %v2433_v44, %s2288_s24 }
 0x411   : > { %v1034_v61 = vpop.xlane.xlu0 %1033 }
 0x412   : > { %v1056_v62 = vsub.f32 %v1024_v6, %v1034_v61 }
 0x414   : > { %v1064_v63 = vmul.f32 1.442695, %v1056_v62 }
 0x415   : > { %1128 = vrot.lane.b32.xlu0 %v2421_v40, %s2288_s24 }
 0x416   : > { %2230 = vpow2.f32 %v1064_v63 }
 0x41b   : > { %v1037_v43 = vpop.xlane.xlu1 %1036 }
 0x41c   : > { %v1057_v44 = vsub.f32 %v1025_v13, %v1037_v43 }
 0x41e   : > { %v1066_v40 = vmul.f32 1.442695, %v1057_v44 }
 0x420   : > { %v2531_v3 = vpop.eup %2230  ;;  %2232 = vpow2.f32 %v1066_v40 }
 0x421   : > { %v1080_v5 = vsel %vm627_vm2, %v2531_v3, 0.0 }
 0x42a   : > { %v2538_v6 = vpop.eup %2232 }
 0x42b   : > { %v1083_v7 = vsel %vm627_vm2, %v2538_v6, 0.0 }
 0x432   : > { %1054 = vmax.xlane.f32.xlu1 %v1053_v4 }
 0x434   : > { %1081 = vadd.xlane.f32.xlu0 %v1080_v5 }
 0x443   : > { %1273 = vrot.lane.b32.xlu1 %v2436_v45, %s2288_s24 }
 0x467   : > { %1084 = vadd.xlane.f32.xlu1 %v1083_v7 }
 0x478   : > { %1369 = vrot.lane.b32.xlu1 %v2445_v50, %s2288_s24 }
 0x47c   : > { %v1040_v8 = vpop.xlane.xlu0 %1039 }
 0x47d   : > { %v1058_v9 = vsub.f32 %v2505_v20, %v1040_v8 }
 0x47f   : > { %v1068_v10 = vmul.f32 1.442695, %v1058_v9 }
 0x480   : > { %v1043_v11 = vpop.xlane.xlu0 %1042 }
 0x481   : > { %2234 = vpow2.f32 %v1068_v10  ;;  %v1059_v45 = vsub.f32 %v2507_v24, %v1043_v11 }
 0x483   : > { %v1070_v14 = vmul.f32 1.442695, %v1059_v45 }
 0x484   : > { %v1046_v13 = vpop.xlane.xlu0 %1045 }
 0x485   : > { %2236 = vpow2.f32 %v1070_v14  ;;  %v1060_v28 = vsub.f32 %v2513_v32, %v1046_v13 }
 0x486   : > { %v1049_v12 = vpop.xlane.xlu1 %1048 }
 0x487   : > { %v1061_v15 = vsub.f32 %v2515_v36, %v1049_v12  ;;  %v1072_v29 = vmul.f32 1.442695, %v1060_v28 }
 0x489   : > { %v1074_v21 = vmul.f32 1.442695, %v1061_v15 }
 0x48a   : > { %v1178_v17 = vpop.permute.xlu1 %1177 }
 0x48b   : > { %v2547_v18 = vpop.eup %2234  ;;  %v1183_v19 = vsel %vm1133_vm3, %v1178_v17, 0  ;;  %2238 = vpow2.f32 %v1074_v21 }
 0x48c   : > { %v1052_v50 = vpop.xlane.xlu0 %1051  ;;  %2117 = vmatpush3.bf16.msra.mxu0 %v1183_v19  ;;  %v1086_v20 = vsel %vm627_vm2, %v2547_v18, 0.0  ;;  %2240 = vpow2.f32 %v1072_v29 }
 0x48d   : > { %1087 = vadd.xlane.f32.xlu0 %v1086_v20  ;;  %2128 = vmatprep.subr.bf16.mxu0 %v2282_v16  ;;  %v1062_v30 = vsub.f32 %v2521_v52, %v1052_v50 }
 0x48e   : > { %v1226_v33 = vpop.permute.xlu1 %1225 }
 0x48f   : > { %v2555_v24 = vpop.eup %2236  ;;  %v1076_v31 = vmul.f32 1.442695, %v1062_v30  ;;  %v1231_v53 = vsel %vm1133_vm3, %v1226_v33, 0 }
 0x490   : > { %v1129_v22 = vpop.permute.xlu0 %1128  ;;  %v1089_v25 = vsel %vm627_vm2, %v2555_v24, 0.0 }
 0x491   : > { %v1135_v23 = vsel %vm1133_vm3, %v1129_v22, 0  ;;  %2242 = vpow2.f32 %v1076_v31 }
 0x492   : > { %2111 = vmatpush3.bf16.msra.mxu1 %v1135_v23 }
 0x493   : > { %2122 = vmatprep.subr.bf16.mxu1 %v2282_v16 }
 0x495   : > { %v2559_v26 = vpop.eup %2238 }
 0x496   : > { %v1095_v27 = vsel %vm627_vm2, %v2559_v26, 0.0  ;;  %v2567_v34 = vpop.eup %2240 }
 0x497   : > { %v1092_v38 = vsel %vm627_vm2, %v2567_v34, 0.0 }
 0x49b   : > { %v2571_v39 = vpop.eup %2242 }
 0x49c   : > { %1090 = vadd.xlane.f32.xlu1 %v1089_v25  ;;  %v1098_v32 = vsel %vm627_vm2, %v2571_v39, 0.0 }
 0x4a0   : > { %1096 = vadd.xlane.f32.xlu1 %v1095_v27 }
 0x4a3   : > { %1321 = vrot.lane.b32.xlu0 %v2441_v47, %s2288_s24 }
 0x4bf   : > { %v1055_v35 = vpop.xlane.xlu1 %1054 }
 0x4c0   : > { %v1063_v36 = vsub.f32 %v1031_v0, %v1055_v35 }
 0x4c1   : > { %v1082_v37 = vpop.xlane.xlu0 %1081 }
 0x4c2   : > { %v1078_v47 = vmul.f32 1.442695, %v1063_v36  ;;  %2244 = vrcp.f32 %v1082_v37  ;;  %1093 = vadd.xlane.f32.xlu0 %v1092_v38 }
 0x4c3   : > { %v1274_v54 = vpop.permute.xlu1 %1273 }
 0x4c4   : > { %2246 = vpow2.f32 %v1078_v47  ;;  %v1279_v59 = vsel %vm1133_vm3, %v1274_v54, 0  ;;  %v2214_v54 = vld [vmem:[%s2728_s6] sm:$0xff]  }
 0x4c6   : > { %1099 = vadd.xlane.f32.xlu0 %v1098_v32 }
 0x4cc   : > { %v2245_v41 = vpop.eup %2244 }
 0x4cd   : > { %v1112_v42 = vmul.f32 %v2245_v41, %v2531_v3 }
 0x4ce   : > { %v2576_v48 = vpop.eup %2246 }
 0x4cf   : > { %v1101_v49 = vsel %vm627_vm2, %v2576_v48, 0.0  ;;  %v1120_v52 = vpack.c.bf16 %v1112_v42, %v1112_v42 }
 0x4d0   : > { %1102 = vadd.xlane.f32.xlu1 %v1101_v49 }
 0x4d1   : > { %2113 = vmatmul.mubr.msk.bf16.vlgmr.msra.gmra.mrb[12].mxu1 %vm627_vm2, %v1120_v52 }
 0x4d2   : > { %2123 = vmatpush3.bf16.msra.mxu1 %v1231_v53  ;;  %2124 = vmatprep.mubr.msk.bf16.mxu1 %vm2283_vm1, %v2282_v16 }
 0x4d3   : > { %2134 = vmatprep.subr.bf16.mxu1 %v2282_v16 }
 0x4dc   : > { %1417 = vrot.lane.b32.xlu0 %v2439_v46, %s2288_s24 }
 0x4e1   : > { %1465 = vrot.lane.b32.xlu1 %v2450_v51, %s2288_s24 }
 0x4f4   : > { %v1085_v55 = vpop.xlane.xlu1 %1084 }
 0x4f5   : > { %2248 = vrcp.f32 %v1085_v55 }
 0x4f8   : > { %v1370_v60 = vpop.permute.xlu1 %1369 }
 0x4ff   : > { %v2249_v56 = vpop.eup %2248 }
 0x500   : > { %v1113_v57 = vmul.f32 %v2249_v56, %v2538_v6  ;;  %v1375_v6 = vsel %vm1133_vm3, %v1370_v60, 0 }
 0x502   : > { %v1121_v58 = vpack.c.bf16 %v1113_v57, %v1113_v57 }
 0x504   : > { %2119 = vmatmul.mubr.msk.bf16.vlgmr.msra.gmra.mrb[24].mxu0 %vm627_vm2, %v1121_v58 }
 0x505   : > { %2129 = vmatpush3.bf16.msra.mxu0 %v1279_v59  ;;  %2130 = vmatprep.mubr.msk.bf16.mxu0 %vm2283_vm1, %v2282_v16 }
 0x506   : > { %2140 = vmatprep.subr.bf16.mxu0 %v2282_v16 }
 0x51a   : > { %v1088_v46 = vpop.xlane.xlu0 %1087 }
 0x51b   : > { %2250 = vrcp.f32 %v1088_v46  ;;  %v2215_v46 = vld [vmem:[%s2728_s6 + $0x8] sm:$0xff]  }
 0x51e   : > { %v1322_v62 = vpop.permute.xlu0 %1321 }
 0x51f   : > { %v1327_v3 = vsel %vm1133_vm3, %v1322_v62, 0 }
 0x525   : > { %v2251_v51 = vpop.eup %2250 }
 0x526   : > { %v1114_v61 = vmul.f32 %v2251_v51, %v2547_v18 }
 0x528   : > { %v1122_v63 = vpack.c.bf16 %v1114_v61, %v1114_v61 }
 0x529   : > { %v1091_v0 = vpop.xlane.xlu1 %1090 }
 0x52a   : > { %2252 = vrcp.f32 %v1091_v0  ;;  %2125 = vmatmul.mubr.msk.bf16.vlgmr.msra.gmra.mrb[16].mxu1 %vm627_vm2, %v1122_v63 }
 0x52b   : > { %2135 = vmatpush3.bf16.msra.mxu1 %v1327_v3  ;;  %2136 = vmatprep.mubr.msk.bf16.mxu1 %vm2283_vm1, %v2282_v16 }
 0x52c   : > { %2146 = vmatprep.subr.bf16.mxu1 %v2282_v16 }
 0x52d   : > { %v1097_v4 = vpop.xlane.xlu1 %1096 }
 0x52e   : > { %2254 = vrcp.f32 %v1097_v4 }
 0x534   : > { %v2253_v5 = vpop.eup %2252 }
 0x535   : > { %v1115_v43 = vmul.f32 %v2253_v5, %v2555_v24 }
 0x537   : > { %v1123_v44 = vpack.c.bf16 %v1115_v43, %v1115_v43 }
 0x538   : > { %v2255_v40 = vpop.eup %2254 }
 0x539   : > { %2131 = vmatmul.mubr.msk.bf16.vlgmr.msra.gmra.mrb[28].mxu0 %vm627_vm2, %v1123_v44  ;;  %v1117_v7 = vmul.f32 %v2255_v40, %v2559_v26 }
 0x53a   : > { %2141 = vmatpush3.bf16.msra.mxu0 %v1375_v6  ;;  %2142 = vmatprep.mubr.msk.bf16.mxu0 %vm2283_vm1, %v2282_v16 }
 0x53b   : > { %2152 = vmatprep.subr.bf16.mxu0 %v2282_v16  ;;  %v1125_v8 = vpack.c.bf16 %v1117_v7, %v1117_v7 }
 0x541   : > { %2143 = vmatmul.mubr.msk.bf16.vlgmr.msra.gmra.mrb[32].mxu0 %vm627_vm2, %v1125_v8 }
 0x542   : > { %2154 = vmatprep.mubr.msk.bf16.mxu0 %vm2283_vm1, %v2282_v16 }
 0x54f   : > { %v1094_v9 = vpop.xlane.xlu0 %1093 }
 0x550   : > { %2256 = vrcp.f32 %v1094_v9 }
 0x553   : > { %v1100_v10 = vpop.xlane.xlu0 %1099 }
 0x554   : > { %2258 = vrcp.f32 %v1100_v10 }
 0x557   : > { %v1418_v12 = vpop.permute.xlu0 %1417 }
 0x558   : > { %v1423_v17 = vsel %vm1133_vm3, %v1418_v12, 0 }
 0x55a   : > { %v2257_v11 = vpop.eup %2256 }
 0x55b   : > { %v1116_v45 = vmul.f32 %v2257_v11, %v2567_v34 }
 0x55d   : > { %v1103_v13 = vpop.xlane.xlu1 %1102  ;;  %v1124_v14 = vpack.c.bf16 %v1116_v45, %v1116_v45 }
 0x55e   : > { %v2259_v15 = vpop.eup %2258  ;;  %2260 = vrcp.f32 %v1103_v13 }
 0x55f   : > { %2137 = vmatmul.mubr.msk.bf16.vlgmr.msra.gmra.mrb[20].mxu1 %vm627_vm2, %v1124_v14  ;;  %v1118_v18 = vmul.f32 %v2259_v15, %v2571_v39 }
 0x560   : > { %2147 = vmatpush3.bf16.msra.mxu1 %v1423_v17  ;;  %2148 = vmatprep.mubr.msk.bf16.mxu1 %vm2283_vm1, %v2282_v16 }
 0x561   : > { %v1466_v19 = vpop.permute.xlu1 %1465  ;;  %2158 = vmatprep.subr.bf16.mxu1 %v2282_v16  ;;  %v1126_v20 = vpack.c.bf16 %v1118_v18, %v1118_v18 }
 0x562   : > { %v1471_v50 = vsel %vm1133_vm3, %v1466_v19, 0  ;;  %v1976_v19 = vld [vmem:[%s2729_s7] ss:$0 sm:$0xff] }
 0x563   : > { %2153 = vmatpush3.bf16.msra.mxu0 %v1471_v50 }
 0x564   : > { %2166 = vmatprep.subr.bf16.mxu0 %v2282_v16 }
 0x567   : > { %2149 = vmatmul.mubr.msk.bf16.vlgmr.msra.gmra.mrb[24].mxu1 %vm627_vm2, %v1126_v20 }
 0x568   : > { %v2261_v21 = vpop.eup %2260  ;;  %2162 = vmatprep.mubr.msk.bf16.mxu1 %vm2283_vm1, %v2282_v16  ;;  %2159 = vmatpush3.bf16.msra.mxu1 %v2214_v54  ;;  %v1981_v54 = vld [vmem:[%s2730_s8] ss:$0 sm:$0xff] }
 0x569   : > { %v1119_v22 = vmul.f32 %v2261_v21, %v2576_v48  ;;  %2160 = vmatprep.subr.bf16.mxu1 %v2282_v16 }
 0x56b   : > { %v1127_v23 = vpack.c.bf16 %v1119_v22, %v1119_v22 }
 0x56c   : > { %2161 = vmatpush3.bf16.msra.mxu1 %v2215_v46 }
 0x56d   : > { %2155 = vmatmul.mubr.msk.bf16.vlgmr.msra.gmra.mrb[36].mxu0 %vm627_vm2, %v1127_v23  ;;  %2174 = vmatprep.subr.bf16.mxu1 %v2282_v16 }
 0x56e   : > { %2170 = vmatprep.mubr.msk.bf16.mxu0 %vm2283_vm1, %v2282_v16 }
 0x5a4   : > { %v2627_v24 = vpop.f32.mrb[12].mxu1 }
 0x5a5   : > { %v2114_v25 = vpop.f32.mrb[13].mxu1  ;;  %v1513_v8 = vpack.c.bf16 %v2627_v24, %v2627_v24 }
 0x5a6   : > { %v1174_v26 = vpop.f32.mrb[14].mxu1 }
 0x5a7   : > { %v2115_v27 = vpop.f32.mrb[15].mxu1 }
 0x5d7   : > { %v1219_v28 = vpop.f32.mrb[24].mxu0 }
 0x5d8   : > { %v2120_v29 = vpop.f32.mrb[25].mxu0  ;;  %v1514_v9 = vpack.c.bf16 %v1219_v28, %v1219_v28 }
 0x5d9   : > { %v1222_v30 = vpop.f32.mrb[26].mxu0 }
 0x5da   : > { %v2121_v31 = vpop.f32.mrb[27].mxu0 }
 0x5fd   : > { %v1267_v33 = vpop.f32.mrb[16].mxu1 }
 0x5fe   : > { %v1515_v34 = vpack.c.bf16 %v1267_v33, %v1267_v33  ;;  %v2126_v35 = vpop.f32.mrb[17].mxu1 }
 0x5ff   : > { %v1270_v36 = vpop.f32.mrb[18].mxu1 }
 0x600   : > { %1523 = vrot.lane.b32.xlu0 %v1515_v34, %s2289_s25  ;;  %v2127_v37 = vpop.f32.mrb[19].mxu1 }
 0x60c   : > { %v1315_v38 = vpop.f32.mrb[28].mxu0 }
 0x60d   : > { %v1516_v39 = vpack.c.bf16 %v1315_v38, %v1315_v38  ;;  %v2132_v47 = vpop.f32.mrb[29].mxu0  ;;  %v2216_v38 = vld [vmem:[%s2732_s10] sm:$0xff]  }
 0x60e   : > { %v1318_v32 = vpop.f32.mrb[30].mxu0  ;;  %2167 = vmatpush3.bf16.msra.mxu0 %v2216_v38 }
 0x60f   : > { %1525 = vrot.lane.b32.xlu1 %v1516_v39, %s2289_s25  ;;  %v2133_v41 = vpop.f32.mrb[31].mxu0  ;;  %v2217_v39 = vld [vmem:[%s2732_s10 + $0x8] sm:$0xff]   ;;  %2168 = vmatprep.subr.bf16.mxu0 %v2282_v16  ;;  %s488_s25 = scalar_lea.vmem %s2736_s14, %s1948_s16 }
 0x612   : > { %2169 = vmatpush3.bf16.msra.mxu0 %v2217_v39 }
 0x614   : > { %v1411_v42 = vpop.f32.mrb[32].mxu0 }
 0x615   : > { %v1518_v48 = vpack.c.bf16 %v1411_v42, %v1411_v42  ;;  %v2144_v49 = vpop.f32.mrb[33].mxu0 }
 0x616   : > { %v1414_v52 = vpop.f32.mrb[34].mxu0 }
 0x617   : > { %1531 = vrot.lane.b32.xlu1 %v1518_v48, %s2290_s26  ;;  %v2145_v53 = vpop.f32.mrb[35].mxu0 }
 0x632   : > { %v1363_v55 = vpop.f32.mrb[20].mxu1 }
 0x633   : > { %v1517_v56 = vpack.c.bf16 %v1363_v55, %v1363_v55  ;;  %v2138_v57 = vpop.f32.mrb[21].mxu1 }
 0x634   : > { %v1366_v58 = vpop.f32.mrb[22].mxu1 }
 0x635   : > { %1529 = vrot.lane.b32.xlu0 %v1517_v56, %s2290_s26  ;;  %v2139_v59 = vpop.f32.mrb[23].mxu1  ;;  %v1982_v58 = vld [vmem:[%s2731_s9] ss:$0 sm:$0xff] }
 0x63a   : > { %v1459_v51 = vpop.f32.mrb[24].mxu1 }
 0x63b   : > { %v1519_v60 = vpack.c.bf16 %v1459_v51, %v1459_v51  ;;  %v2150_v61 = vpop.f32.mrb[25].mxu1 }
 0x63c   : > { %v1462_v62 = vpop.f32.mrb[26].mxu1  ;;  %v2218_v61 = vld [vmem:[%s2734_s12] sm:$0xff]  }
 0x63d   : > { %1535 = vrot.lane.b32.xlu0 %v1519_v60, %s2291_s18  ;;  %v2151_v63 = vpop.f32.mrb[27].mxu1  ;;  %v2219_v62 = vld [vmem:[%s2734_s12 + $0x8] sm:$0xff]  }
 0x63e   : > { %v2220_v63 = vld [vmem:[%s2734_s12 + $0x10] sm:$0xff]  }
 0x640   : > { %v1507_v0 = vpop.f32.mrb[36].mxu0 }
 0x641   : > { %v1520_v3 = vpack.c.bf16 %v1507_v0, %v1507_v0  ;;  %v2156_v4 = vpop.f32.mrb[37].mxu0  ;;  %v2221_v0 = vld [vmem:[%s2734_s12 + $0x18] sm:$0xff]  }
 0x642   : > { %v1510_v5 = vpop.f32.mrb[38].mxu0  ;;  %v2223_v4 = vld [vmem:[%s2734_s12 + $0x28] sm:$0xff]  }
 0x643   : > { %1537 = vrot.lane.b32.xlu1 %v1520_v3, %s2291_s18  ;;  %v2157_v43 = vpop.f32.mrb[39].mxu0  ;;  %v2222_v3 = vld [vmem:[%s2734_s12 + $0x20] sm:$0xff]   ;;  %v2224_v5 = vld [vmem:[%s2734_s12 + $0x30] sm:$0xff]  }
 0x644   : > { %v2225_v43 = vld [vmem:[%s2734_s12 + $0x38] sm:$0xff]  }
 0x672   : > { %v1524_v44 = vpop.permute.xlu0 %1523 }
 0x673   : > { %v1541_v11 = vsel %vm627_vm2, %v1513_v8, %v1524_v44  ;;  %v1983_v44 = vld [vmem:[%s2733_s11] ss:$0 sm:$0xff] }
 0x681   : > { %v1526_v40 = vpop.permute.xlu1 %1525 }
 0x682   : > { %v1544_v45 = vsel %vm627_vm2, %v1514_v9, %v1526_v40 }
 0x689   : > { %v1532_v7 = vpop.permute.xlu1 %1531 }
 0x68a   : > { %v1549_v12 = vsel %vm1545_vm4, %v1544_v45, %v1532_v7 }
 0x6a7   : > { %v1530_v6 = vpop.permute.xlu0 %1529 }
 0x6a8   : > { %v1547_v13 = vsel %vm1545_vm4, %v1541_v11, %v1530_v6 }
 0x6af   : > { %v1536_v10 = vpop.permute.xlu0 %1535 }
 0x6b0   : > { %v1552_v15 = vsel %vm1550_vm5, %v1547_v13, %v1536_v10 }
 0x6b5   : > { %v1538_v14 = vpop.permute.xlu1 %1537 }
 0x6b6   : > { %v1554_v17 = vsel %vm1550_vm5, %v1549_v12, %v1538_v14 }
 0x6b7   : > { %v1977_v18 = vcombine.low %v1552_v15, %v1554_v17 }
 0x6b9   : > { %2163 = vmatmul.mubr.msk.bf16.vlgmr.msra.gmra.mrb[28].mxu1 %vm495_vm0, %v1977_v18 }
 0x6ba   : > { %2190 = vmatprep.mubr.msk.bf16.mxu1 %vm2283_vm1, %v2282_v16  ;;  %2175 = vmatpush3.bf16.msra.mxu1 %v2218_v61 }
 0x6bb   : > { %2176 = vmatprep.subr.bf16.mxu1 %v2282_v16 }
 0x6be   : > { %2177 = vmatpush3.bf16.msra.mxu1 %v2219_v62 }
 0x6bf   : > { %2178 = vmatprep.subr.bf16.mxu1 %v2282_v16 }
 0x6c2   : > { %2179 = vmatpush3.bf16.msra.mxu1 %v2220_v63 }
 0x6c3   : > { %2180 = vmatprep.subr.bf16.mxu1 %v2282_v16 }
 0x6c6   : > { %2181 = vmatpush3.bf16.msra.mxu1 %v2221_v0 }
 0x6c7   : > { %2182 = vmatprep.subr.bf16.mxu1 %v2282_v16 }
 0x6ca   : > { %2183 = vmatpush3.bf16.msra.mxu1 %v2222_v3 }
 0x6cb   : > { %2184 = vmatprep.subr.bf16.mxu1 %v2282_v16 }
 0x6ce   : > { %2185 = vmatpush3.bf16.msra.mxu1 %v2223_v4 }
 0x6cf   : > { %2186 = vmatprep.subr.bf16.mxu1 %v2282_v16 }
 0x6d2   : > { %2187 = vmatpush3.bf16.msra.mxu1 %v2224_v5 }
 0x6d3   : > { %2188 = vmatprep.subr.bf16.mxu1 %v2282_v16 }
 0x6d6   : > { %2189 = vmatpush3.bf16.msra.mxu1 %v2225_v43 }
 0x78c   : > { %v1620_v50 = vpop.f32.mrb[28].mxu1 }
 0x78d   : > { %v1621_v20 = vadd.f32 %v1976_v19, %v1620_v50  ;;  %v2164_v21 = vpop.f32.mrb[29].mxu1 }
 0x78e   : > { %v1623_v22 = vpop.f32.mrb[30].mxu1 }
 0x78f   : > { %v2648_v23 = vadd.f32 %v2383_v1, %v1621_v20  ;;  %v1624_v24 = vadd.f32 %v1976_v19, %v1623_v22  ;;  %v2165_v25 = vpop.f32.mrb[31].mxu1  ;;  %v1989_v22 = vld [vmem:[%s2735_s13] ss:$0 sm:$0xff] }
 0x791   : > { %v2651_v26 = vadd.f32 %v2385_v2, %v1624_v24  ;;  %v1629_v27 = vsel %vm495_vm0, %v2648_v23, 0.0 }
 0x792   : > { %1630 = vadd.xlane.f32.xlu0 %v1629_v27 }
 0x793   : > { %v1632_v28 = vsel %vm495_vm0, %v2651_v26, 0.0 }
 0x794   : > { %1633 = vadd.xlane.f32.xlu1 %v1632_v28 }
 0x81f   : > { %v1631_v29 = vpop.xlane.xlu0 %1630 }
 0x820   : > { %v1635_v30 = vmul.f32 0.03125, %v1631_v29 }
 0x821   : > { %v1634_v31 = vpop.xlane.xlu1 %1633 }
 0x822   : > { %v1637_v33 = vsub.f32 %v2648_v23, %v1635_v30  ;;  %v1636_v1 = vmul.f32 0.03125, %v1634_v31 }
 0x824   : > { %v1638_v34 = vsub.f32 %v2651_v26, %v1636_v1  ;;  %v1639_v35 = vmul.f32 %v1637_v33, %v1637_v33 }
 0x826   : > { %v1641_v2 = vsel %vm495_vm0, %v1639_v35, 0.0  ;;  %v1640_v36 = vmul.f32 %v1638_v34, %v1638_v34 }
 0x827   : > { %1642 = vadd.xlane.f32.xlu0 %v1641_v2 }
 0x828   : > { %v1644_v37 = vsel %vm495_vm0, %v1640_v36, 0.0 }
 0x82b   : > { %1645 = vadd.xlane.f32.xlu0 %v1644_v37 }
 0x8b4   : > { %v1643_v47 = vpop.xlane.xlu0 %1642 }
 0x8b5   : > { %v1647_v32 = vmul.f32 0.03125, %v1643_v47 }
 0x8b7   : > { %v1649_v41 = vadd.f32 1e-05, %v1647_v32 }
 0x8b8   : > { %v1646_v42 = vpop.xlane.xlu0 %1645 }
 0x8b9   : > { %2262 = vrsqrt.f32 %v1649_v41  ;;  %v1648_v48 = vmul.f32 0.03125, %v1646_v42 }
 0x8bb   : > { %v1650_v49 = vadd.f32 1e-05, %v1648_v48 }
 0x8bd   : > { %2264 = vrsqrt.f32 %v1650_v49 }
 0x8c3   : > { %v2263_v52 = vpop.eup %2262 }
 0x8c4   : > { %v1653_v53 = vmul.f32 %v2263_v52, %v1637_v33 }
 0x8c6   : > { %v1662_v56 = vmul.f32 %v1981_v54, %v1653_v53 }
 0x8c7   : > { %v2265_v55 = vpop.eup %2264 }
 0x8c8   : > { %v1654_v57 = vmul.f32 %v2265_v55, %v1638_v34  ;;  %v1671_v46 = vadd.f32 %v1982_v58, %v1662_v56 }
 0x8ca   : > { %v1663_v59 = vmul.f32 %v1981_v54, %v1654_v57 }
 0x8cc   : > { %v1672_v51 = vadd.f32 %v1982_v58, %v1663_v59 }
 0x8ce   : > { %v1673_v60 = vpack.c.bf16 %v1672_v51, %v1671_v46 }
 0x8d0   : > { %2171 = vmatmul.mubr.msk.bf16.vlgmr.msra.gmra.mrb[40].mxu0 %vm495_vm0, %v1673_v60 }
 0x9a3   : > { %v1734_v40 = vpop.f32.mrb[40].mxu0 }
 0x9a4   : > { %v1735_v6 = vadd.f32 %v1983_v44, %v1734_v40  ;;  %v2172_v7 = vpop.f32.mrb[41].mxu0 }
 0x9a5   : > { %v1737_v8 = vpop.f32.mrb[42].mxu0 }
 0x9a6   : > { %v1987_v9 = vmul.f32 -1.702, %v1735_v6  ;;  %v1738_v10 = vadd.f32 %v1983_v44, %v1737_v8  ;;  %v2173_v11 = vpop.f32.mrb[43].mxu0 }
 0x9a8   : > { %v1745_v45 = vmul.f32 1.442695, %v1987_v9  ;;  %v1988_v12 = vmul.f32 -1.702, %v1738_v10 }
 0x9aa   : > { %2266 = vpow2.f32 %v1745_v45  ;;  %v1747_v16 = vmul.f32 1.442695, %v1988_v12 }
 0x9ac   : > { %2268 = vpow2.f32 %v1747_v16 }
 0x9b4   : > { %v2267_v13 = vpop.eup %2266 }
 0x9b5   : > { %v1749_v14 = vadd.f32 1.0, %v2267_v13 }
 0x9b6   : > { %v2269_v15 = vpop.eup %2268 }
 0x9b7   : > { %2270 = vrcp.f32 %v1749_v14  ;;  %v1750_v17 = vadd.f32 1.0, %v2269_v15 }
 0x9b9   : > { %2272 = vrcp.f32 %v1750_v17 }
 0x9c1   : > { %v2271_v18 = vpop.eup %2270 }
 0x9c2   : > { %v1755_v50 = vmul.f32 %v2271_v18, %v1735_v6 }
 0x9c3   : > { %v2273_v19 = vpop.eup %2272 }
 0x9c4   : > { %v1756_v20 = vmul.f32 %v2273_v19, %v1738_v10 }
 0x9c6   : > { %v1757_v21 = vpack.c.bf16 %v1756_v20, %v1755_v50 }
 0x9c8   : > { %2191 = vmatmul.mubr.bf16.vlgmr.msra.gmra.mrb[32].mxu1 %v1757_v21 }
 0xa9b   : > { %v1863_v24 = vpop.f32.mrb[32].mxu1 }
 0xa9c   : > { %v1864_v25 = vadd.f32 %v1989_v22, %v1863_v24  ;;  %v2192_v27 = vpop.f32.mrb[33].mxu1 }
 0xa9d   : > { %v1866_v28 = vpop.f32.mrb[34].mxu1 }
 0xa9e   : > { %v1870_v29 = vadd.f32 %v1864_v25, %v2648_v23  ;;  %v1867_v30 = vadd.f32 %v1989_v22, %v1866_v28  ;;  %v2193_v31 = vpop.f32.mrb[35].mxu1 }
 0xaa0   : > { %v1872_v33 = vpack.c.bf16 %v1870_v29, %v1870_v29  ;;  %v1871_v1 = vadd.f32 %v1867_v30, %v2651_v26 }
 0xaa2   : > { %1875 = vst.msk [vmem:[%s488_s25] sm:$0xf] %vm1874_vm6, %v1872_v33  ;;  %v1873_v34 = vpack.c.bf16 %v1871_v1, %v1871_v1 }
 0xaa4   : > { %1876 = vst.msk [vmem:[%s488_s25 + $0x4] sm:$0xf] %vm1874_vm6, %v1873_v34 }
 0xaa5 PF: > { %s24_s29 = sadd.s32 1, %s2280_s29  }
 0xaa6   : > { %p21_p4 = scmp.ge.s32.totalorder %s24_s29, 4  }
 0xaa8   :  { %23 = sbr.rel (!%p21_p4) target bundleno = 1 (0x1), region = 109 }

</bundles_post_ra>
